<compile_context>
chip_gen: v6e
topology: v6e:2x2x1
jax: 0.10.0
libtpu: 0.0.40
codegen_flags: <defaults>
</compile_context>

<pallas_src>
import jax
import jax.numpy as jnp
from jax import lax
from jax.experimental import pallas as pl
from jax.experimental.pallas import tpu as pltpu


_MAX_BT = 1024   # max batch rows per grid step (multiple of 128)


def _ffm_kernel(gidx_ref, wab_ref, o_ref):
    # gidx_ref: (BT, F)       int32 VMEM block; gidx[b, f] = f*V + x[b, f]
    # wab_ref : (F*V, 2*AC)   f32 VMEM, constant block index => resident across grid
    # o_ref   : (BT//128, 128) f32 lane-dense per-tile output block
    bt, num_fields = gidx_ref.shape
    fv = wab_ref.shape[0]
    ac = wab_ref.shape[1] // 2

    gidx = gidx_ref[...]                                          # (BT, F) int32
    lane = lax.broadcasted_iota(jnp.int32, (bt, fv), 1)           # (BT, F*V)

    # One-hot over the F*V "global id" lanes: F broadcast-compares on the VPU.
    # Matches are disjoint across fields, so a sum builds the 0/1 mask exactly.
    oh = jnp.zeros((bt, fv), dtype=jnp.float32)
    for f in range(num_fields):
        oh = oh + (lane == gidx[:, f:f + 1]).astype(jnp.float32)

    # One MXU matmul = embedding gather + pair packing for the whole tile.
    ab = jnp.dot(oh, wab_ref[...], preferred_element_type=jnp.float32)  # (BT, 2*AC)

    a = ab[:, :ac]          # A[b, p*D+d] = E_{j_p}(x[b, i_p])[d]  (128-aligned slice)
    b = ab[:, ac:]          # B[b, p*D+d] = E_{i_p}(x[b, j_p])[d]
    c = a * b               # zero-padded lanes contribute 0 to the reduction

    # Per-row sum, packed lane-dense: (BT, AC) -> (BT//128, 128, AC) -> (BT//128, 128)
    o_ref[...] = jnp.sum(c.reshape(bt // 128, 128, ac), axis=-1)


@jax.jit
def ffm_forward(x_idx, weights):
    """Field-aware factorization interaction term.

    x_idx:   (B, F) integer vocabulary indices.
    weights: (F, V, D) float32 stacked per-field embedding tables
             (weights[t] == embeddings[t].weight in the PyTorch module).
    returns: (B, 1) float32, matching the PyTorch forward.
    """
    num_fields, vocab, dim = weights.shape
    batch = x_idx.shape[0]
    assert x_idx.shape[1] == num_fields

    num_pairs = num_fields * (num_fields - 1) // 2
    pd = num_pairs * dim
    ac = pl.cdiv(pd, 128) * 128                     # lane-aligned slab width

    # Constant pair-weight matrix (built once per trace; cache in a real model).
    w = weights.astype(jnp.float32)
    wa = jnp.zeros((num_fields, vocab, ac), jnp.float32)
    wb = jnp.zeros((num_fields, vocab, ac), jnp.float32)
    p = 0
    for i in range(num_fields - 1):
        for j in range(i + 1, num_fields):
            wa = wa.at[i, :, p * dim:(p + 1) * dim].set(w[j])   # A-slab: E_j via x[:, i]
            wb = wb.at[j, :, p * dim:(p + 1) * dim].set(w[i])   # B-slab: E_i via x[:, j]
            p += 1
    wab = jnp.concatenate(
        [wa.reshape(num_fields * vocab, ac), wb.reshape(num_fields * vocab, ac)],
        axis=1)                                                  # (F*V, 2*AC)

    # Batch tiling: multiple of 128 rows (lane-dense output), up to _MAX_BT.
    bt = min(_MAX_BT, pl.cdiv(max(batch, 1), 128) * 128)
    b_pad = pl.cdiv(batch, bt) * bt

    # Clamp OOB indices (PyTorch would raise), pad batch, fold in field offsets.
    x_clamped = jnp.clip(x_idx.astype(jnp.int32), 0, vocab - 1)
    x_pad = jnp.zeros((b_pad, num_fields), jnp.int32).at[:batch].set(x_clamped)
    gidx = x_pad + (jnp.arange(num_fields, dtype=jnp.int32) * vocab)[None, :]

    out_pad = pl.pallas_call(
        _ffm_kernel,
        out_shape=jax.ShapeDtypeStruct((b_pad // 128, 128), jnp.float32),
        grid_spec=pltpu.PrefetchScalarGridSpec(
            num_scalar_prefetch=0,
            grid=(b_pad // bt,),
            in_specs=[
                pl.BlockSpec((bt, num_fields), lambda i: (i, 0)),
                # Whole pair-weight matrix, constant block index => DMA'd once.
                pl.BlockSpec((num_fields * vocab, 2 * ac), lambda i: (0, 0)),
            ],
            out_specs=pl.BlockSpec((bt // 128, 128), lambda i: (i, 0)),
        ),
        compiler_params=pltpu.CompilerParams(
            dimension_semantics=("parallel",),     # megacore-shard batch tiles (v7x)
            vmem_limit_bytes=32 * 1024 * 1024,     # explicit, v7x-safe budget
        ),
    )(gidx, wab)

    return out_pad.reshape(-1)[:batch].reshape(batch, 1)


def ffm_reference(x_idx, weights):
    """Pure-JAX mirror of the PyTorch module's forward."""
    num_fields = weights.shape[0]
    xs = [weights[t][x_idx] for t in range(num_fields)]          # each (B, F, D)
    terms = []
    for i in range(num_fields - 1):
        for j in range(i + 1, num_fields):
            terms.append(xs[j][:, i] * xs[i][:, j])
    ix = jnp.stack(terms, axis=1)                                # (B, P, D)
    return jnp.sum(jnp.sum(ix, axis=1), axis=1, keepdims=True)


if __name__ == "__main__":
    vocabulary_size = 32
    num_fields = 8
    embed_dim = 4
    batch_size = 2

    key = jax.random.PRNGKey(0)
    k_w, k_x = jax.random.split(key)

    # xavier_uniform_ init for each per-field table (same scheme as the module).
    bound = (6.0 / (vocabulary_size + embed_dim)) ** 0.5
    weights = jax.random.uniform(
        k_w, (num_fields, vocabulary_size, embed_dim),
        minval=-bound, maxval=bound, dtype=jnp.float32)

    x = jax.random.randint(
        k_x, (batch_size, num_fields), 0, vocabulary_size, dtype=jnp.int32)

    out = ffm_forward(x, weights)
    out = jax.block_until_ready(out)

    ref = ffm_reference(x, weights)
    assert out.shape == (batch_size, 1)
    assert jnp.allclose(out, ref, atol=1e-4, rtol=1e-4), (out, ref)

    print("KERNEL_OK")
</pallas_src>

<mosaic_0001>
module attributes {stable_mosaic.version = 11 : i64} {
  func.func @_ffm_kernel(%arg0: i32, %arg1: memref<128x8xi32, #tpu.memory_space<vmem>>, %arg2: memref<256x256xf32, #tpu.memory_space<vmem>>, %arg3: memref<1x128xf32, #tpu.memory_space<vmem>>) attributes {dimension_semantics = [#tpu.dimension_semantics<parallel>], iteration_bounds = array<i64: 1>, scalar_prefetch = 0 : i64, scratch_operands = 0 : i64, tpu.core_type = #tpu.core_type<tc>, window_params = [{transform_indices = @transform_0, window_bounds = array<i64: 128, 8>}, {pipeline_mode = #tpu.pipeline_mode<synchronous>, transform_indices = @transform_1, window_bounds = array<i64: 256, 256>}, {transform_indices = @transform_2, window_bounds = array<i64: 1, 128>}]} {
    %c0 = arith.constant 0 : index
    %c0_0 = arith.constant 0 : index
    %0 = vector.load %arg1[%c0, %c0_0] : memref<128x8xi32, #tpu.memory_space<vmem>>, vector<128x8xi32>
    %1 = tpu.iota {dimensions = array<i32: 1>} : vector<128x256xi32>
    %cst = arith.constant 0.000000e+00 : f32
    %2 = vector.broadcast %cst : f32 to vector<128x256xf32>
    %3 = vector.extract_strided_slice %0 {offsets = [0, 0], sizes = [128, 1], strides = [1, 1]} : vector<128x8xi32> to vector<128x1xi32>
    %4 = vector.broadcast %3 : vector<128x1xi32> to vector<128x256xi32>
    %5 = arith.cmpi eq, %1, %4 : vector<128x256xi32>
    %6 = arith.extui %5 : vector<128x256xi1> to vector<128x256xi32>
    %7 = arith.sitofp %6 : vector<128x256xi32> to vector<128x256xf32>
    %8 = arith.addf %2, %7 : vector<128x256xf32>
    %9 = vector.extract_strided_slice %0 {offsets = [0, 1], sizes = [128, 1], strides = [1, 1]} : vector<128x8xi32> to vector<128x1xi32>
    %10 = vector.broadcast %9 : vector<128x1xi32> to vector<128x256xi32>
    %11 = arith.cmpi eq, %1, %10 : vector<128x256xi32>
    %12 = arith.extui %11 : vector<128x256xi1> to vector<128x256xi32>
    %13 = arith.sitofp %12 : vector<128x256xi32> to vector<128x256xf32>
    %14 = arith.addf %8, %13 : vector<128x256xf32>
    %15 = vector.extract_strided_slice %0 {offsets = [0, 2], sizes = [128, 1], strides = [1, 1]} : vector<128x8xi32> to vector<128x1xi32>
    %16 = vector.broadcast %15 : vector<128x1xi32> to vector<128x256xi32>
    %17 = arith.cmpi eq, %1, %16 : vector<128x256xi32>
    %18 = arith.extui %17 : vector<128x256xi1> to vector<128x256xi32>
    %19 = arith.sitofp %18 : vector<128x256xi32> to vector<128x256xf32>
    %20 = arith.addf %14, %19 : vector<128x256xf32>
    %21 = vector.extract_strided_slice %0 {offsets = [0, 3], sizes = [128, 1], strides = [1, 1]} : vector<128x8xi32> to vector<128x1xi32>
    %22 = vector.broadcast %21 : vector<128x1xi32> to vector<128x256xi32>
    %23 = arith.cmpi eq, %1, %22 : vector<128x256xi32>
    %24 = arith.extui %23 : vector<128x256xi1> to vector<128x256xi32>
    %25 = arith.sitofp %24 : vector<128x256xi32> to vector<128x256xf32>
    %26 = arith.addf %20, %25 : vector<128x256xf32>
    %27 = vector.extract_strided_slice %0 {offsets = [0, 4], sizes = [128, 1], strides = [1, 1]} : vector<128x8xi32> to vector<128x1xi32>
    %28 = vector.broadcast %27 : vector<128x1xi32> to vector<128x256xi32>
    %29 = arith.cmpi eq, %1, %28 : vector<128x256xi32>
    %30 = arith.extui %29 : vector<128x256xi1> to vector<128x256xi32>
    %31 = arith.sitofp %30 : vector<128x256xi32> to vector<128x256xf32>
    %32 = arith.addf %26, %31 : vector<128x256xf32>
    %33 = vector.extract_strided_slice %0 {offsets = [0, 5], sizes = [128, 1], strides = [1, 1]} : vector<128x8xi32> to vector<128x1xi32>
    %34 = vector.broadcast %33 : vector<128x1xi32> to vector<128x256xi32>
    %35 = arith.cmpi eq, %1, %34 : vector<128x256xi32>
    %36 = arith.extui %35 : vector<128x256xi1> to vector<128x256xi32>
    %37 = arith.sitofp %36 : vector<128x256xi32> to vector<128x256xf32>
    %38 = arith.addf %32, %37 : vector<128x256xf32>
    %39 = vector.extract_strided_slice %0 {offsets = [0, 6], sizes = [128, 1], strides = [1, 1]} : vector<128x8xi32> to vector<128x1xi32>
    %40 = vector.broadcast %39 : vector<128x1xi32> to vector<128x256xi32>
    %41 = arith.cmpi eq, %1, %40 : vector<128x256xi32>
    %42 = arith.extui %41 : vector<128x256xi1> to vector<128x256xi32>
    %43 = arith.sitofp %42 : vector<128x256xi32> to vector<128x256xf32>
    %44 = arith.addf %38, %43 : vector<128x256xf32>
    %45 = vector.extract_strided_slice %0 {offsets = [0, 7], sizes = [128, 1], strides = [1, 1]} : vector<128x8xi32> to vector<128x1xi32>
    %46 = vector.broadcast %45 : vector<128x1xi32> to vector<128x256xi32>
    %47 = arith.cmpi eq, %1, %46 : vector<128x256xi32>
    %48 = arith.extui %47 : vector<128x256xi1> to vector<128x256xi32>
    %49 = arith.sitofp %48 : vector<128x256xi32> to vector<128x256xf32>
    %50 = arith.addf %44, %49 : vector<128x256xf32>
    %c0_1 = arith.constant 0 : index
    %c0_2 = arith.constant 0 : index
    %51 = vector.load %arg2[%c0_1, %c0_2] : memref<256x256xf32, #tpu.memory_space<vmem>>, vector<256x256xf32>
    %cst_3 = arith.constant dense<0.000000e+00> : vector<128x256xf32>
    %52 = tpu.matmul %50, %51, %cst_3 {dimension_numbers = #tpu.dot_dimension_numbers<[1], [0], [0], [1], [0, 0, 1, 1], [], []>} : vector<128x256xf32>, vector<256x256xf32>, vector<128x256xf32> -> vector<128x256xf32>
    %53 = vector.extract_strided_slice %52 {offsets = [0, 0], sizes = [128, 128], strides = [1, 1]} : vector<128x256xf32> to vector<128x128xf32>
    %54 = vector.extract_strided_slice %52 {offsets = [0, 128], sizes = [128, 128], strides = [1, 1]} : vector<128x256xf32> to vector<128x128xf32>
    %55 = arith.mulf %53, %54 : vector<128x128xf32>
    %56 = vector.shape_cast %55 : vector<128x128xf32> to vector<1x128x128xf32>
    %cst_4 = arith.constant dense<0.000000e+00> : vector<1x128xf32>
    %57 = vector.multi_reduction <add>, %56, %cst_4 [2] : vector<1x128x128xf32> to vector<1x128xf32>
    %c0_5 = arith.constant 0 : index
    %c0_6 = arith.constant 0 : index
    %58 = vector.load %arg3[%c0_5, %c0_6] : memref<1x128xf32, #tpu.memory_space<vmem>>, vector<1x128xf32>
    tpu.vector_store %arg3[%c0_5, %c0_6], %57 {strides = array<i32>} : memref<1x128xf32, #tpu.memory_space<vmem>>, vector<1x128xf32>,
    return
  }
  func.func @transform_0(%arg0: i32) -> (i32, i32) {
    %c0_i32 = arith.constant 0 : i32
    %c0_i32_0 = arith.constant 0 : i32
    return %arg0, %c0_i32 : i32, i32
  }
  func.func @transform_1(%arg0: i32) -> (i32, i32) {
    %c0_i32 = arith.constant 0 : i32
    %c0_i32_0 = arith.constant 0 : i32
    %c0_i32_1 = arith.constant 0 : i32
    return %c0_i32, %c0_i32_0 : i32, i32
  }
  func.func @transform_2(%arg0: i32) -> (i32, i32) {
    %c0_i32 = arith.constant 0 : i32
    %c0_i32_0 = arith.constant 0 : i32
    return %arg0, %c0_i32 : i32, i32
  }
}

</mosaic_0001>

<bundles_post_ra>
// kernel: ffm_forward.1
= control target key start
LH: loop header
LB: loop body
LE: loop exit
PB: predicated region body
PF: predicated region fallthrough
CT: control target
= control target key end

     0   :  { %v2238_v0 = vmov 0   ;;  %v2239_v17 = vmov 1   ;;  %v4147_v18 = vmov 2   ;;  %v4151_v19 = vmov 4   ;;  %s4144_s0 = inlined_call_operand.vmem [shape: s32[128,8], index: 0, kind: input, shape index: {}]   ;;  %s4145_s1 = inlined_call_operand.vmem [shape: f32[256,256], index: 1, kind: input, shape index: {}]   ;;  %s4146_s2 = inlined_call_operand.vmem [shape: f32[1,128], index: 2, kind: output, shape index: {}]  }
   0x1   :  { %2172 = vset.pattern.permute.xlu1 %v2238_v0  ;;  %2171 = vset.pattern.permute.xlu0 %v2238_v0  ;;  %v2265_v1 = vld [vmem:[%s4144_s0 + $0x10] sm:$0xff]  ;;  %v2270_v2 = vld [vmem:[%s4144_s0] sm:$0xff]  ;;  %v2277_v3 = vld [vmem:[%s4144_s0 + $0x18] sm:$0xff]  ;;  %v4153_v20 = vmov 3   ;;  %v4149_v44 = vmov 6   ;;  %v4158_v54 = vmov 5  }
   0x2   :  { %37 = vperm.xlu1 %2172, %v2265_v1   ;;  %31 = vperm.xlu0 %2171, %v2270_v2   ;;  %v2282_v4 = vld [vmem:[%s4144_s0 + $0x8] sm:$0xff]  ;;  %v2294_v6 = vld [vmem:[%s4144_s0 + $0x20] sm:$0xff]  ;;  %v2301_v7 = vld [vmem:[%s4144_s0 + $0x38] sm:$0xff]  ;;  %v4155_v56 = vmov 7  }
   0x3   :  { %v2289_v5 = vld [vmem:[%s4144_s0 + $0x28] sm:$0xff]  ;;  %v2306_v8 = vld [vmem:[%s4144_s0 + $0x30] sm:$0xff]  ;;  %v2318_v10 = vld [vmem:[%s4144_s0 + $0x40] sm:$0xff] }
   0x4   :  { %v2313_v9 = vld [vmem:[%s4144_s0 + $0x48] sm:$0xff]  ;;  %v2325_v11 = vld [vmem:[%s4144_s0 + $0x58] sm:$0xff]  ;;  %v2330_v12 = vld [vmem:[%s4144_s0 + $0x50] sm:$0xff] }
   0x5   :  { %v2337_v13 = vld [vmem:[%s4144_s0 + $0x68] sm:$0xff]  ;;  %v2342_v14 = vld [vmem:[%s4144_s0 + $0x60] sm:$0xff]  ;;  %v2349_v15 = vld [vmem:[%s4144_s0 + $0x78] sm:$0xff] }
   0x6   :  { %40 = vperm.xlu1 %2172, %v2277_v3   ;;  %34 = vperm.xlu0 %2171, %v2282_v4   ;;  %v2354_v16 = vld [vmem:[%s4144_s0 + $0x70] sm:$0xff]  ;;  %v1469_v21 = vld [vmem:[%s4145_s1 + $0xf8] sm:$0xff]  ;;  %v1467_v23 = vld [vmem:[%s4145_s1 + $0xe8] sm:$0xff] }
   0x7   :  { %2098 = vmatprep.subr.mxu1 %v1469_v21  ;;  %v1468_v22 = vld [vmem:[%s4145_s1 + $0xf0] sm:$0xff]  ;;  %v1466_v24 = vld [vmem:[%s4145_s1 + $0xe0] sm:$0xff]  ;;  %1502 = vmatprep.subr.mxu0 %v1469_v21  ;;  %v1465_v25 = vld [vmem:[%s4145_s1 + $0xd8] sm:$0xff] }
   0x8   :  { %2130 = vmatpush1.msra.mxu1 %v1468_v22  ;;  %v1464_v26 = vld [vmem:[%s4145_s1 + $0xd0] sm:$0xff]  ;;  %1503 = vmatpush1.msra.mxu0 %v1468_v22  ;;  %v1463_v27 = vld [vmem:[%s4145_s1 + $0xc8] sm:$0xff]  ;;  %v1462_v28 = vld [vmem:[%s4145_s1 + $0xc0] sm:$0xff] }
   0x9   :  { %2099 = vmatprep.subr.mxu1 %v1467_v23  ;;  %1504 = vmatprep.subr.mxu0 %v1467_v23  ;;  %v1461_v29 = vld [vmem:[%s4145_s1 + $0xb8] sm:$0xff]  ;;  %v1460_v30 = vld [vmem:[%s4145_s1 + $0xb0] sm:$0xff]  ;;  %v1459_v31 = vld [vmem:[%s4145_s1 + $0xa8] sm:$0xff] }
   0xa   :  { %46 = vperm.xlu1 %2172, %v2289_v5   ;;  %43 = vperm.xlu0 %2171, %v2294_v6   ;;  %v1458_v32 = vld [vmem:[%s4145_s1 + $0xa0] sm:$0xff]  ;;  %v1457_v33 = vld [vmem:[%s4145_s1 + $0x98] sm:$0xff]  ;;  %v1456_v34 = vld [vmem:[%s4145_s1 + $0x90] sm:$0xff] }
   0xb   :  { %2131 = vmatpush1.msra.mxu1 %v1466_v24  ;;  %1505 = vmatpush1.msra.mxu0 %v1466_v24  ;;  %v1455_v35 = vld [vmem:[%s4145_s1 + $0x88] sm:$0xff]  ;;  %v2446_v36 = vld [vmem:[%s4145_s1 + $0x80] sm:$0xff]  ;;  %v2451_v37 = vld [vmem:[%s4145_s1 + $0x78] sm:$0xff] }
   0xc   :  { %2100 = vmatprep.subr.mxu1 %v1465_v25  ;;  %1506 = vmatprep.subr.mxu0 %v1465_v25  ;;  %v2457_v38 = vld [vmem:[%s4145_s1 + $0x70] sm:$0xff]  ;;  %v2464_v39 = vld [vmem:[%s4145_s1 + $0x68] sm:$0xff]  ;;  %v2471_v40 = vld [vmem:[%s4145_s1 + $0x60] sm:$0xff] }
   0xd   :  { %2132 = vmatpush1.msra.mxu1 %v1464_v26  ;;  %1507 = vmatpush1.msra.mxu0 %v1464_v26  ;;  %v2477_v41 = vld [vmem:[%s4145_s1 + $0x58] sm:$0xff]  ;;  %v2483_v42 = vld [vmem:[%s4145_s1 + $0x50] sm:$0xff]  ;;  %v2490_v43 = vld [vmem:[%s4145_s1 + $0x48] sm:$0xff] }
   0xe   :  { %52 = vperm.xlu1 %2172, %v2301_v7   ;;  %49 = vperm.xlu0 %2171, %v2306_v8   ;;  %v2497_v45 = vld [vmem:[%s4145_s1 + $0x40] sm:$0xff]  ;;  %v2504_v46 = vld [vmem:[%s4145_s1 + $0x38] sm:$0xff]  ;;  %v2510_v47 = vld [vmem:[%s4145_s1 + $0x30] sm:$0xff] }
   0xf   :  { %2101 = vmatprep.subr.mxu1 %v1463_v27  ;;  %1508 = vmatprep.subr.mxu0 %v1463_v27  ;;  %v2517_v48 = vld [vmem:[%s4145_s1 + $0x28] sm:$0xff]  ;;  %v2523_v49 = vld [vmem:[%s4145_s1 + $0x20] sm:$0xff]  ;;  %v2530_v50 = vld [vmem:[%s4145_s1 + $0x18] sm:$0xff] }
  0x10   :  { %2133 = vmatpush1.msra.mxu1 %v1462_v28  ;;  %1509 = vmatpush1.msra.mxu0 %v1462_v28  ;;  %v2537_v51 = vld [vmem:[%s4145_s1 + $0x10] sm:$0xff]  ;;  %v2544_v52 = vld [vmem:[%s4145_s1 + $0x8] sm:$0xff]  ;;  %v2551_v53 = vld [vmem:[%s4145_s1] sm:$0xff] }
  0x11   :  { %2102 = vmatprep.subr.mxu1 %v1461_v29  ;;  %1510 = vmatprep.subr.mxu0 %v1461_v29  ;;  %v2558_v55 = vld [vmem:[%s4145_s1 + $0x1f8] sm:$0xff]  ;;  %v2565_v57 = vld [vmem:[%s4145_s1 + $0x1f0] sm:$0xff]  ;;  %v2579_v60 = vld [vmem:[%s4145_s1 + $0x1e8] sm:$0xff] }
  0x12   :  { %58 = vperm.xlu1 %2172, %v2313_v9   ;;  %55 = vperm.xlu0 %2171, %v2318_v10   ;;  %v2586_v61 = vld [vmem:[%s4145_s1 + $0x1e0] sm:$0xff]  ;;  %v2593_v62 = vld [vmem:[%s4145_s1 + $0x1d8] sm:$0xff]  ;;  %v2612_v21 = vld [vmem:[%s4145_s1 + $0x1c8] sm:$0xff] }
  0x13   :  { %2134 = vmatpush1.msra.mxu1 %v1460_v30  ;;  %1511 = vmatpush1.msra.mxu0 %v1460_v30  ;;  %v2619_v22 = vld [vmem:[%s4145_s1 + $0x1c0] sm:$0xff]  ;;  %v2631_v25 = vld [vmem:[%s4145_s1 + $0x1b8] sm:$0xff]  ;;  %v2638_v26 = vld [vmem:[%s4145_s1 + $0x1b0] sm:$0xff] }
  0x14   :  { %2103 = vmatprep.subr.mxu1 %v1459_v31  ;;  %1512 = vmatprep.subr.mxu0 %v1459_v31  ;;  %v2645_v27 = vld [vmem:[%s4145_s1 + $0x1a8] sm:$0xff]  ;;  %v2652_v28 = vld [vmem:[%s4145_s1 + $0x1a0] sm:$0xff]  ;;  %v2663_v31 = vld [vmem:[%s4145_s1 + $0x198] sm:$0xff] }
  0x15   :  { %2135 = vmatpush1.msra.mxu1 %v1458_v32  ;;  %1513 = vmatpush1.msra.mxu0 %v1458_v32  ;;  %v2669_v32 = vld [vmem:[%s4145_s1 + $0x190] sm:$0xff] }
  0x16   :  { %64 = vperm.xlu1 %2172, %v2325_v11   ;;  %61 = vperm.xlu0 %2171, %v2330_v12  }
  0x17   :  { %2104 = vmatprep.subr.mxu1 %v1457_v33  ;;  %1514 = vmatprep.subr.mxu0 %v1457_v33  ;;  %v2678_v33 = vld [vmem:[%s4145_s1 + $0x188] sm:$0xff] }
  0x18   :  { %2136 = vmatpush1.msra.mxu1 %v1456_v34  ;;  %1515 = vmatpush1.msra.mxu0 %v1456_v34 }
  0x19   :  { %2105 = vmatprep.subr.mxu1 %v1455_v35  ;;  %1516 = vmatprep.subr.mxu0 %v1455_v35 }
  0x1a   :  { %70 = vperm.xlu1 %2172, %v2337_v13   ;;  %67 = vperm.xlu0 %2171, %v2342_v14  }
  0x1b   :  { %2137 = vmatpush1.msra.mxu1 %v2446_v36  ;;  %1517 = vmatpush1.msra.mxu0 %v2446_v36  ;;  %v2692_v36 = vld [vmem:[%s4145_s1 + $0x180] sm:$0xff] }
  0x1c   :  { %2106 = vmatprep.subr.mxu1 %v2451_v37  ;;  %1518 = vmatprep.subr.mxu0 %v2451_v37  ;;  %v2699_v37 = vld [vmem:[%s4145_s1 + $0x178] sm:$0xff] }
  0x1d   :  { %2138 = vmatpush1.msra.mxu1 %v2457_v38  ;;  %1519 = vmatpush1.msra.mxu0 %v2457_v38 }
  0x1e   :  { %76 = vperm.xlu1 %2172, %v2349_v15   ;;  %73 = vperm.xlu0 %2171, %v2354_v16  }
  0x1f   :  { %2107 = vmatprep.subr.mxu1 %v2464_v39  ;;  %1520 = vmatprep.subr.mxu0 %v2464_v39 }
  0x20   :  { %2139 = vmatpush1.msra.mxu1 %v2471_v40  ;;  %1521 = vmatpush1.msra.mxu0 %v2471_v40  ;;  %v2711_v40 = vld [vmem:[%s4145_s1 + $0x170] sm:$0xff] }
  0x21   :  { %2108 = vmatprep.subr.mxu1 %v2477_v41  ;;  %1522 = vmatprep.subr.mxu0 %v2477_v41  ;;  %v2720_v41 = vld [vmem:[%s4145_s1 + $0x168] sm:$0xff] }
  0x22   :  { %2174 = vset.pattern.permute.xlu1 %v2239_v17  ;;  %2173 = vset.pattern.permute.xlu0 %v2239_v17  ;;  %v2605_v17 = vld [vmem:[%s4145_s1 + $0x1d0] sm:$0xff] }
  0x23   :  { %210 = vperm.xlu1 %2174, %v2282_v4   ;;  %207 = vperm.xlu0 %2173, %v2270_v2  }
  0x24   :  { %2140 = vmatpush1.msra.mxu1 %v2483_v42  ;;  %1523 = vmatpush1.msra.mxu0 %v2483_v42 }
  0x25   :  { %2109 = vmatprep.subr.mxu1 %v2490_v43  ;;  %1524 = vmatprep.subr.mxu0 %v2490_v43 }
  0x26   :  { %2141 = vmatpush1.msra.mxu1 %v2497_v45  ;;  %1525 = vmatpush1.msra.mxu0 %v2497_v45  ;;  %v2741_v45 = vld [vmem:[%s4145_s1 + $0x158] sm:$0xff] }
  0x27   :  { %213 = vperm.xlu1 %2174, %v2265_v1   ;;  %216 = vperm.xlu0 %2173, %v2277_v3  }
  0x28   :  { %2110 = vmatprep.subr.mxu1 %v2504_v46  ;;  %1526 = vmatprep.subr.mxu0 %v2504_v46 }
  0x29   :  { %2142 = vmatpush1.msra.mxu1 %v2510_v47  ;;  %1527 = vmatpush1.msra.mxu0 %v2510_v47  ;;  %v2753_v47 = vld [vmem:[%s4145_s1 + $0x150] sm:$0xff] }
  0x2a   :  { %2111 = vmatprep.subr.mxu1 %v2517_v48  ;;  %1528 = vmatprep.subr.mxu0 %v2517_v48  ;;  %v2760_v48 = vld [vmem:[%s4145_s1 + $0x148] sm:$0xff] }
  0x2b   :  { %219 = vperm.xlu1 %2174, %v2294_v6   ;;  %222 = vperm.xlu0 %2173, %v2289_v5  }
  0x2c   :  { %2143 = vmatpush1.msra.mxu1 %v2523_v49  ;;  %1529 = vmatpush1.msra.mxu0 %v2523_v49 }
  0x2d   :  { %2112 = vmatprep.subr.mxu1 %v2530_v50  ;;  %1530 = vmatprep.subr.mxu0 %v2530_v50 }
  0x2e   :  { %2144 = vmatpush1.msra.mxu1 %v2537_v51  ;;  %1531 = vmatpush1.msra.mxu0 %v2537_v51  ;;  %v2775_v51 = vld [vmem:[%s4145_s1 + $0x140] sm:$0xff] }
  0x2f   :  { %225 = vperm.xlu1 %2174, %v2306_v8   ;;  %228 = vperm.xlu0 %2173, %v2301_v7  }
  0x30   :  { %2113 = vmatprep.subr.mxu1 %v2544_v52  ;;  %1532 = vmatprep.subr.mxu0 %v2544_v52  ;;  %v2781_v52 = vld [vmem:[%s4145_s1 + $0x138] sm:$0xff] }
  0x31   :  { %2145 = vmatpush1.msra.mxu1 %v2551_v53  ;;  %1533 = vmatpush1.msra.mxu0 %v2551_v53 }
  0x32   :  { %2114 = vmatprep.subr.mxu1 %v2558_v55  ;;  %1534 = vmatprep.subr.mxu0 %v2558_v55 }
  0x33   :  { %231 = vperm.xlu1 %2174, %v2318_v10   ;;  %234 = vperm.xlu0 %2173, %v2313_v9  }
  0x34   :  { %2146 = vmatpush2.msra.mxu1 %v2565_v57  ;;  %1535 = vmatpush2.msra.mxu0 %v2565_v57 }
  0x35   :  { %2115 = vmatprep.subr.mxu1 %v2579_v60  ;;  %1536 = vmatprep.subr.mxu0 %v2579_v60  ;;  %v2816_v60 = vld [vmem:[%s4145_s1 + $0x120] sm:$0xff] }
  0x36   :  { %2147 = vmatpush2.msra.mxu1 %v2586_v61  ;;  %1537 = vmatpush2.msra.mxu0 %v2586_v61 }
  0x37   :  { %237 = vperm.xlu1 %2174, %v2330_v12   ;;  %240 = vperm.xlu0 %2173, %v2325_v11  }
  0x38   :  { %2116 = vmatprep.subr.mxu1 %v2593_v62  ;;  %1538 = vmatprep.subr.mxu0 %v2593_v62  ;;  %v2838_v62 = vld [vmem:[%s4145_s1 + $0x110] sm:$0xff] }
  0x39   :  { %2148 = vmatpush2.msra.mxu1 %v2605_v17  ;;  %1539 = vmatpush2.msra.mxu0 %v2605_v17 }
  0x3a   :  { %2117 = vmatprep.subr.mxu1 %v2612_v21  ;;  %1540 = vmatprep.subr.mxu0 %v2612_v21  ;;  %v1470_v21 = vld [vmem:[%s4145_s1 + $0x100] sm:$0xff] }
  0x3b   :  { %243 = vperm.xlu1 %2174, %v2342_v14   ;;  %246 = vperm.xlu0 %2173, %v2337_v13  }
  0x3c   :  { %2149 = vmatpush2.msra.mxu1 %v2619_v22  ;;  %1541 = vmatpush2.msra.mxu0 %v2619_v22 }
  0x3d   :  { %2118 = vmatprep.subr.mxu1 %v2631_v25  ;;  %1542 = vmatprep.subr.mxu0 %v2631_v25 }
  0x3e   :  { %2150 = vmatpush2.msra.mxu1 %v2638_v26  ;;  %1543 = vmatpush2.msra.mxu0 %v2638_v26 }
  0x3f   :  { %249 = vperm.xlu1 %2174, %v2354_v16   ;;  %252 = vperm.xlu0 %2173, %v2349_v15  }
  0x40   :  { %2119 = vmatprep.subr.mxu1 %v2645_v27  ;;  %1544 = vmatprep.subr.mxu0 %v2645_v27 }
  0x41   :  { %2151 = vmatpush2.msra.mxu1 %v2652_v28  ;;  %1545 = vmatpush2.msra.mxu0 %v2652_v28 }
  0x42   :  { %2120 = vmatprep.subr.mxu1 %v2663_v31  ;;  %1546 = vmatprep.subr.mxu0 %v2663_v31  ;;  %v4193_v31 = vmov 6  }
  0x43   :  { %2175 = vset.pattern.permute.xlu1 %v4147_v18  ;;  %2186 = vset.pattern.permute.xlu0 %v4151_v19 }
  0x44   :  { %383 = vperm.xlu1 %2175, %v2270_v2   ;;  %744 = vperm.xlu0 %2186, %v2277_v3  }
  0x45   :  { %2152 = vmatpush2.msra.mxu1 %v2669_v32  ;;  %1547 = vmatpush2.msra.mxu0 %v2669_v32 }
  0x46   :  { %2121 = vmatprep.subr.mxu1 %v2678_v33  ;;  %1548 = vmatprep.subr.mxu0 %v2678_v33 }
  0x47   :  { %2153 = vmatpush2.msra.mxu1 %v2692_v36  ;;  %1549 = vmatpush2.msra.mxu0 %v2692_v36  ;;  %v4195_v36 = vmov 3  }
  0x48   :  { %389 = vperm.xlu1 %2175, %v2265_v1   ;;  %750 = vperm.xlu0 %2186, %v2289_v5  }
  0x49   :  { %2122 = vmatprep.subr.mxu1 %v2699_v37  ;;  %1550 = vmatprep.subr.mxu0 %v2699_v37 }
  0x4a   :  { %2154 = vmatpush2.msra.mxu1 %v2711_v40  ;;  %1551 = vmatpush2.msra.mxu0 %v2711_v40 }
  0x4b   :  { %2123 = vmatprep.subr.mxu1 %v2720_v41  ;;  %1552 = vmatprep.subr.mxu0 %v2720_v41 }
  0x4c   :  { %392 = vperm.xlu1 %2175, %v2277_v3   ;;  %771 = vperm.xlu0 %2186, %v2342_v14  }
  0x50   :  { %398 = vperm.xlu1 %2175, %v2289_v5   ;;  %2205 = vset.pattern.permute.xlu0 %v4153_v20 }
  0x51   :  { %559 = vperm.xlu0 %2205, %v2270_v2  }
  0x54   :  { %404 = vperm.xlu1 %2175, %v2301_v7  }
  0x55   :  { %565 = vperm.xlu0 %2205, %v2265_v1  }
  0x58   :  { %410 = vperm.xlu1 %2175, %v2313_v9  }
  0x59   :  { %592 = vperm.xlu0 %2205, %v2325_v11  }
  0x5c   :  { %416 = vperm.xlu1 %2175, %v2325_v11  }
  0x5d   :  { %580 = vperm.xlu0 %2205, %v2301_v7  }
  0x60   :  { %2176 = vset.pattern.permute.xlu1 %v4151_v19 }
  0x61   :  { %735 = vperm.xlu1 %2176, %v2270_v2   ;;  %2207 = vset.pattern.permute.xlu0 %v4147_v18  ;;  %v2796_v18 = vld [vmem:[%s4145_s1 + $0x130] sm:$0xff] }
  0x62   :  { %386 = vperm.xlu0 %2207, %v2282_v4  }
  0x65   :  { %2177 = vset.pattern.permute.xlu1 %v4153_v20 }
  0x66   :  { %562 = vperm.xlu1 %2177, %v2282_v4   ;;  %395 = vperm.xlu0 %2207, %v2294_v6  }
  0x6a   :  { %2178 = vset.pattern.permute.xlu1 %v4151_v19  ;;  %401 = vperm.xlu0 %2207, %v2306_v8  }
  0x6b   :  { %738 = vperm.xlu1 %2178, %v2282_v4  }
  0x6e   :  { %407 = vperm.xlu0 %2207, %v2318_v10  }
  0x6f   :  { %2179 = vset.pattern.permute.xlu1 %v4149_v44 }
  0x70   :  { %1087 = vperm.xlu1 %2179, %v2270_v2  }
  0x72   :  { %413 = vperm.xlu0 %2207, %v2330_v12  }
  0x74   :  { %2180 = vset.pattern.permute.xlu1 %v4153_v20 }
  0x75   :  { %583 = vperm.xlu1 %2180, %v2318_v10  }
  0x76   :  { %425 = vperm.xlu0 %2207, %v2354_v16  }
  0x79   :  { %2181 = vset.pattern.permute.xlu1 %v4158_v54 }
  0x7a   :  { %914 = vperm.xlu1 %2181, %v2282_v4   ;;  %2211 = vset.pattern.permute.xlu0 %v4155_v56 }
  0x7b   :  { %1263 = vperm.xlu0 %2211, %v2270_v2  }
  0x7d   :  { %v2571_v58 = vpop.permute.xlu1 %37  ;;  %v2573_v59 = vpop.permute.xlu0 %31 }
  0x7e   :  { %2182 = vset.pattern.permute.xlu1 %v4151_v19 }
  0x7f   :  { %741 = vperm.xlu1 %2182, %v2265_v1   ;;  %1287 = vperm.xlu0 %2211, %v2318_v10  }
  0x81   :  { %v2597_v63 = vpop.permute.xlu1 %40  ;;  %v2599_v0 = vpop.permute.xlu0 %34 }
  0x83   :  { %759 = vperm.xlu1 %2182, %v2318_v10   ;;  %1272 = vperm.xlu0 %2211, %v2277_v3  }
  0x85   :  { %v2623_v23 = vpop.permute.xlu1 %46  ;;  %v2625_v24 = vpop.permute.xlu0 %43 }
  0x87   :  { %2183 = vset.pattern.permute.xlu1 %v4153_v20  ;;  %1293 = vperm.xlu0 %2211, %v2330_v12  }
  0x88   :  { %568 = vperm.xlu1 %2183, %v2277_v3  }
  0x89   :  { %v2654_v29 = vpop.permute.xlu1 %52  ;;  %v2656_v30 = vpop.permute.xlu0 %49 }
  0x8a   :  { %4180 = vst [vmem:[#allocation2_spill] sm:$0xff] %v2656_v30 }
  0x8b   :  { %1299 = vperm.xlu0 %2211, %v2342_v14  }
  0x8c   :  { %586 = vperm.xlu1 %2183, %v2313_v9  }
  0x8d   :  { %v2680_v34 = vpop.permute.xlu1 %58  ;;  %v2682_v35 = vpop.permute.xlu0 %55 }
  0x8f   :  { %2217 = vset.pattern.permute.xlu0 %v4149_v44 }
  0x90   :  { %2184 = vset.pattern.permute.xlu1 %v4158_v54  ;;  %1090 = vperm.xlu0 %2217, %v2282_v4  }
  0x91   :  { %v2701_v38 = vpop.permute.xlu1 %64  ;;  %935 = vperm.xlu1 %2184, %v2318_v10   ;;  %v2704_v39 = vpop.permute.xlu0 %61 }
  0x94   :  { %1111 = vperm.xlu0 %2217, %v2318_v10   ;;  %v2732_v10 = vld [vmem:[%s4145_s1 + $0x160] sm:$0xff] }
  0x95   :  { %v2722_v42 = vpop.permute.xlu1 %70  ;;  %2185 = vset.pattern.permute.xlu1 %v4155_v56  ;;  %v2725_v43 = vpop.permute.xlu0 %67  ;;  %2155 = vmatpush2.msra.mxu1 %v2732_v10 }
  0x96   :  { %4181 = vst [vmem:[#allocation3_spill] sm:$0xff] %v2722_v42  ;;  %4182 = vst [vmem:[#allocation4_spill] sm:$0xff] %v2725_v43  ;;  %1266 = vperm.xlu1 %2185, %v2282_v4   ;;  %2124 = vmatprep.subr.mxu1 %v2741_v45 }
  0x97   :  { %2156 = vmatpush2.msra.mxu1 %v2753_v47  ;;  %1553 = vmatpush2.msra.mxu0 %v2732_v10 }
  0x98   :  { %1096 = vperm.xlu0 %2217, %v2277_v3   ;;  %2125 = vmatprep.subr.mxu1 %v2760_v48 }
  0x99   :  { %v2743_v46 = vpop.permute.xlu1 %76  ;;  %v2745_v4 = vpop.permute.xlu0 %73  ;;  %2157 = vmatpush2.msra.mxu1 %v2775_v51  ;;  %1554 = vmatprep.subr.mxu0 %v2741_v45 }
  0x9a   :  { %4183 = vst [vmem:[#allocation5_spill] sm:$0xff] %v2743_v46  ;;  %4184 = vst [vmem:[#allocation6_spill] sm:$0xff] %v2745_v4  ;;  %2187 = vset.pattern.permute.xlu1 %v4151_v19  ;;  %2126 = vmatprep.subr.mxu1 %v2781_v52  ;;  %v4187_v4 = vmov 7  }
  0x9b   :  { %762 = vperm.xlu1 %2187, %v2313_v9   ;;  %2158 = vmatpush2.msra.mxu1 %v2796_v18 }
  0x9c   :  { %1117 = vperm.xlu0 %2217, %v2330_v12   ;;  %1555 = vmatpush2.msra.mxu0 %v2753_v47 }
  0x9d   :  { %1556 = vmatprep.subr.mxu0 %v2760_v48 }
  0x9e   :  { %v2766_v49 = vpop.permute.xlu1 %210  ;;  %v2768_v50 = vpop.permute.xlu0 %207  ;;  %1557 = vmatpush2.msra.mxu0 %v2775_v51 }
  0x9f   :  { %2188 = vset.pattern.permute.xlu1 %v4149_v44  ;;  %v2803_v44 = vld [vmem:[%s4145_s1 + $0x128] sm:$0xff]  ;;  %1558 = vmatprep.subr.mxu0 %v2781_v52 }
  0xa0   :  { %1093 = vperm.xlu1 %2188, %v2265_v1   ;;  %1105 = vperm.xlu0 %2217, %v2306_v8  }
  0xa1   :  { %2127 = vmatprep.subr.mxu1 %v2803_v44  ;;  %1559 = vmatpush2.msra.mxu0 %v2796_v18 }
  0xa2   :  { %v2786_v53 = vpop.permute.xlu1 %213  ;;  %v2788_v55 = vpop.permute.xlu0 %216  ;;  %2159 = vmatpush2.msra.mxu1 %v2816_v60  ;;  %1560 = vmatprep.subr.mxu0 %v2803_v44 }
  0xa3   :  { %1561 = vmatpush2.msra.mxu0 %v2816_v60 }
  0xa4   :  { %2189 = vset.pattern.permute.xlu1 %v4153_v20  ;;  %1108 = vperm.xlu0 %2217, %v2301_v7   ;;  %v2824_v20 = vld [vmem:[%s4145_s1 + $0x118] sm:$0xff] }
  0xa5   :  { %571 = vperm.xlu1 %2189, %v2294_v6   ;;  %2128 = vmatprep.subr.mxu1 %v2824_v20 }
  0xa6   :  { %v2806_v57 = vpop.permute.xlu1 %219  ;;  %v2808_v19 = vpop.permute.xlu0 %222  ;;  %2160 = vmatpush2.msra.mxu1 %v2838_v62  ;;  %1562 = vmatprep.subr.mxu0 %v2824_v20 }
  0xa7   :  { %1563 = vmatpush2.msra.mxu0 %v2838_v62 }
  0xa8   :  { %2220 = vset.pattern.permute.xlu0 %v4158_v54 }
  0xa9   :  { %589 = vperm.xlu1 %2189, %v2330_v12   ;;  %911 = vperm.xlu0 %2220, %v2270_v2   ;;  %v2844_v2 = vld [vmem:[%s4145_s1 + $0x108] sm:$0xff] }
  0xaa   :  { %v2827_v61 = vpop.permute.xlu1 %225  ;;  %v2829_v56 = vpop.permute.xlu0 %228  ;;  %2129 = vmatprep.subr.mxu1 %v2844_v2  ;;  %1564 = vmatprep.subr.mxu0 %v2844_v2 }
  0xab   :  { %4185 = vst [vmem:[#allocation7_spill] sm:$0xff] %v2827_v61  ;;  %2161 = vmatpush2.msra.mxu1 %v1470_v21  ;;  %1565 = vmatpush2.msra.mxu0 %v1470_v21 }
  0xad   :  { %2190 = vset.pattern.permute.xlu1 %v4158_v54  ;;  %917 = vperm.xlu0 %2220, %v2265_v1  }
  0xae   :  { %v2847_v46 = vpop.permute.xlu1 %231  ;;  %938 = vperm.xlu1 %2190, %v2313_v9   ;;  %v2850_v17 = vpop.permute.xlu0 %234 }
  0xb1   :  { %920 = vperm.xlu0 %2220, %v2277_v3   ;;  %v4190_v3 = vmov 4  }
  0xb2   :  { %v2860_v54 = vpop.permute.xlu1 %237  ;;  %2191 = vset.pattern.permute.xlu1 %v4187_v4  ;;  %v2863_v42 = vpop.permute.xlu0 %240 }
  0xb3   :  { %4186 = vst [vmem:[#allocation8_spill] sm:$0xff] %v2860_v54  ;;  %1269 = vperm.xlu1 %2191, %v2265_v1  }
  0xb5   :  { %926 = vperm.xlu0 %2220, %v2289_v5  }
  0xb6   :  { %v2868_v22 = vpop.permute.xlu1 %243  ;;  %v2870_v25 = vpop.permute.xlu0 %246 }
  0xb7   :  { %4188 = vst [vmem:[#allocation9_spill] sm:$0xff] %v2868_v22  ;;  %4189 = vst [vmem:[#allocation10_spill] sm:$0xff] %v2870_v25  ;;  %2192 = vset.pattern.permute.xlu1 %v4190_v3 }
  0xb8   :  { %747 = vperm.xlu1 %2192, %v2294_v6  }
  0xb9   :  { %947 = vperm.xlu0 %2220, %v2342_v14  }
  0xba   :  { %v2878_v1 = vpop.permute.xlu1 %249  ;;  %v2882_v26 = vpop.permute.xlu0 %252 }
  0xbb   :  { %4191 = vst [vmem:[#allocation11_spill] sm:$0xff] %v2878_v1  ;;  %4192 = vst [vmem:[#allocation12_spill] sm:$0xff] %v2882_v26 }
  0xbc   :  { %765 = vperm.xlu1 %2192, %v2330_v12  }
  0xbd   :  { %932 = vperm.xlu0 %2220, %v2301_v7   ;;  %v4162_v7 = vlaneseq }
  0xbf   :  { %v2890_v27 = vpop.permute.xlu1 %383  ;;  %v2892_v28 = vpop.permute.xlu0 %744  ;;  %v2918_v41 = vand.u32 127, %v4162_v7 }
  0xc0   :  { %2193 = vset.pattern.permute.xlu1 %v4193_v31 }
  0xc1   :  { %1114 = vperm.xlu1 %2193, %v2313_v9   ;;  %953 = vperm.xlu0 %2220, %v2354_v16   ;;  %v2931_v10 = vadd.s32 128, %v2918_v41  ;;  %vm268_vm0 = vcmp.eq.s32.totalorder %v2918_v41, %v2829_v56  ;;  %vm92_vm2 = vcmp.eq.s32.totalorder %v2918_v41, %v2654_v29  ;;  %vm276_vm4 = vcmp.eq.s32.totalorder %v2918_v41, %v2863_v42 }
  0xc2   :  { %vm100_vm8 = vcmp.eq.s32.totalorder %v2918_v41, %v2701_v38 }
  0xc3   :  { %v2900_v32 = vpop.permute.xlu1 %389  ;;  %v2902_v33 = vpop.permute.xlu0 %750  ;;  %vm269_vm1 = vcmp.eq.s32.totalorder %v2931_v10, %v2829_v56  ;;  %vm93_vm3 = vcmp.eq.s32.totalorder %v2931_v10, %v2654_v29  ;;  %vm277_vm5 = vcmp.eq.s32.totalorder %v2931_v10, %v2863_v42  ;;  %vm101_vm9 = vcmp.eq.s32.totalorder %v2931_v10, %v2701_v38 }
  0xc4   :  { %4194 = vst [vmem:[#allocation13_spill] sm:$0xff] %v2902_v33 }
  0xc5   :  { %2194 = vset.pattern.permute.xlu1 %v4195_v36  ;;  %2224 = vset.pattern.permute.xlu0 %v4190_v3 }
  0xc6   :  { %574 = vperm.xlu1 %2194, %v2289_v5   ;;  %780 = vperm.xlu0 %2224, %v2349_v15   ;;  %v4197_v5 = vmov 5  }
  0xc7   :  { %v2910_v37 = vpop.permute.xlu1 %392  ;;  %v2912_v40 = vpop.permute.xlu0 %771 }
  0xc8   :  { %4196 = vst [vmem:[#allocation14_spill] sm:$0xff] %v2912_v40 }
  0xca   :  { %2195 = vset.pattern.permute.xlu1 %v4197_v5  ;;  %2227 = vset.pattern.permute.xlu0 %v4187_v4 }
  0xcb   :  { %923 = vperm.xlu1 %2195, %v2294_v6   ;;  %v2925_v18 = vpop.permute.xlu1 %398  ;;  %1305 = vperm.xlu0 %2227, %v2354_v16  }
  0xcc   :  { %4198 = vst [vmem:[#allocation15_spill] sm:$0xff] %v2925_v18  ;;  %v2928_v44 = vpop.permute.xlu0 %559 }
  0xcf   :  { %941 = vperm.xlu1 %2195, %v2330_v12   ;;  %v405_v15 = vpop.permute.xlu1 %404  ;;  %v2246_v12 = vmov 0.0  }
  0xd0   :  { %v2944_v20 = vpop.permute.xlu0 %565  ;;  %vm444_vm6 = vcmp.eq.s32.totalorder %v2918_v41, %v405_v15  ;;  %vm445_vm7 = vcmp.eq.s32.totalorder %v2931_v10, %v405_v15  ;;  %v1888_v16 = vsel %vm268_vm0, 1.0, %v2246_v12  ;;  %v1889_v56 = vsel %vm269_vm1, 1.0, %v2246_v12 }
  0xd1   :  { %v1856_v45 = vsel %vm92_vm2, 1.0, %v2246_v12  ;;  %v1857_v29 = vsel %vm93_vm3, 1.0, %v2246_v12  ;;  %v1896_v47 = vsel %vm276_vm4, 1.0, %v2246_v12  ;;  %v1897_v48 = vsel %vm277_vm5, 1.0, %v2246_v12 }
  0xd2   :  { %v1920_v51 = vsel %vm444_vm6, 1.0, %v2246_v12  ;;  %v1921_v52 = vsel %vm445_vm7, 1.0, %v2246_v12  ;;  %v364_v62 = vadd.f32 %v1888_v16, %v1856_v45  ;;  %v365_v2 = vadd.f32 %v1889_v56, %v1857_v29 }
  0xd3   :  { %2196 = vset.pattern.permute.xlu1 %v4187_v4  ;;  %v2961_v42 = vpop.permute.xlu1 %410  ;;  %v1864_v38 = vsel %vm100_vm8, 1.0, %v2246_v12  ;;  %v1865_v21 = vsel %vm101_vm9, 1.0, %v2246_v12  ;;  %v4200_v16 = vmov 2   ;;  %vm82_vm0 = vcmp.eq.s32.totalorder %v2918_v41, %v2571_v58 }
  0xd4   :  { %4199 = vst [vmem:[#allocation16_spill] sm:$0xff] %v2961_v42  ;;  %1290 = vperm.xlu1 %2196, %v2313_v9   ;;  %v593_v60 = vpop.permute.xlu0 %592  ;;  %v372_v15 = vadd.f32 %v1896_v47, %v1864_v38  ;;  %v373_v7 = vadd.f32 %v1897_v48, %v1865_v21  ;;  %v540_v26 = vadd.f32 %v1920_v51, %v364_v62 }
  0xd5   :  { %vm628_vm10 = vcmp.eq.s32.totalorder %v2918_v41, %v593_v60  ;;  %vm629_vm11 = vcmp.eq.s32.totalorder %v2931_v10, %v593_v60  ;;  %v541_v1 = vadd.f32 %v1921_v52, %v365_v2  ;;  %vm83_vm1 = vcmp.eq.s32.totalorder %v2931_v10, %v2571_v58 }
  0xd6   :  { %v1960_v40 = vsel %vm628_vm10, 1.0, %v2246_v12  ;;  %v1961_v9 = vsel %vm629_vm11, 1.0, %v2246_v12  ;;  %vm78_vm2 = vcmp.eq.s32.totalorder %v2918_v41, %v2573_v59  ;;  %vm79_vm3 = vcmp.eq.s32.totalorder %v2931_v10, %v2573_v59 }
  0xd7   :  { %v417_v25 = vpop.permute.xlu1 %416  ;;  %vm84_vm4 = vcmp.eq.s32.totalorder %v2918_v41, %v2597_v63  ;;  %vm85_vm5 = vcmp.eq.s32.totalorder %v2931_v10, %v2597_v63  ;;  %vm80_vm6 = vcmp.eq.s32.totalorder %v2918_v41, %v2599_v0  ;;  %v3047_v58 = vsel %vm83_vm1, 1.0, %v2246_v12 }
  0xd8   :  { %vm452_vm12 = vcmp.eq.s32.totalorder %v2918_v41, %v417_v25  ;;  %vm453_vm13 = vcmp.eq.s32.totalorder %v2931_v10, %v417_v25  ;;  %2197 = vset.pattern.permute.xlu1 %v4200_v16  ;;  %v581_v56 = vpop.permute.xlu0 %580  ;;  %vm81_vm7 = vcmp.eq.s32.totalorder %v2931_v10, %v2599_v0  ;;  %vm88_vm8 = vcmp.eq.s32.totalorder %v2918_v41, %v2623_v23 }
  0xd9   :  { %v1928_v45 = vsel %vm452_vm12, 1.0, %v2246_v12  ;;  %v1929_v29 = vsel %vm453_vm13, 1.0, %v2246_v12  ;;  %vm620_vm14 = vcmp.eq.s32.totalorder %v2918_v41, %v581_v56  ;;  %vm621_vm15 = vcmp.eq.s32.totalorder %v2931_v10, %v581_v56  ;;  %419 = vperm.xlu1 %2197, %v2342_v14  }
  0xda   :  { %v548_v47 = vadd.f32 %v1928_v45, %v372_v15  ;;  %v549_v48 = vadd.f32 %v1929_v29, %v373_v7  ;;  %v1952_v51 = vsel %vm620_vm14, 1.0, %v2246_v12  ;;  %v1953_v52 = vsel %vm621_vm15, 1.0, %v2246_v12 }
  0xdb   :  { %v2984_v25 = vadd.f32 %v1952_v51, %v540_v26  ;;  %v2986_v60 = vadd.f32 %v1953_v52, %v541_v1  ;;  %vm89_vm9 = vcmp.eq.s32.totalorder %v2931_v10, %v2623_v23  ;;  %vm86_vm10 = vcmp.eq.s32.totalorder %v2918_v41, %v2625_v24 }
  0xdc   :  { %v2988_v62 = vpop.permute.xlu1 %735  ;;  %v2990_v2 = vadd.f32 %v1960_v40, %v548_v47  ;;  %v2992_v38 = vadd.f32 %v1961_v9, %v549_v48  ;;  %vm94_vm11 = vcmp.eq.s32.totalorder %v2918_v41, %v2682_v35  ;;  %vm95_vm12 = vcmp.eq.s32.totalorder %v2931_v10, %v2682_v35 }
  0xdd   :  { %4201 = vst [vmem:[#allocation17_spill] sm:$0xff] %v2984_v25  ;;  %4202 = vst [vmem:[#allocation18_spill] sm:$0xff] %v2986_v60  ;;  %2198 = vset.pattern.permute.xlu1 %v4190_v3  ;;  %v2995_v21 = vpop.permute.xlu0 %386  ;;  %v3073_v48 = vsel %vm79_vm3, 1.0, %v2246_v12  ;;  %v1848_v51 = vsel %vm84_vm4, 1.0, %v2246_v12  ;;  %v1849_v52 = vsel %vm85_vm5, 1.0, %v2246_v12  ;;  %v3082_v60 = vsel %vm81_vm7, 1.0, %v2246_v12 }
  0xde   :  { %4203 = vst [vmem:[#allocation19_spill] sm:$0xff] %v2990_v2  ;;  %4204 = vst [vmem:[#allocation20_spill] sm:$0xff] %v2992_v38  ;;  %768 = vperm.xlu1 %2198, %v2325_v11   ;;  %v3085_v25 = vsel %vm88_vm8, 1.0, %v2246_v12  ;;  %vm260_vm13 = vcmp.eq.s32.totalorder %v2918_v41, %v2788_v55  ;;  %vm261_vm14 = vcmp.eq.s32.totalorder %v2931_v10, %v2788_v55  ;;  %v3095_v59 = vsel %vm89_vm9, 1.0, %v2246_v12 }
  0xdf   :  { %v1858_v38 = vsel %vm94_vm11, 1.0, %v2246_v12  ;;  %v1859_v55 = vsel %vm95_vm12, 1.0, %v2246_v12  ;;  %vm256_vm15 = vcmp.eq.s32.totalorder %v2918_v41, %v2766_v49  ;;  %vm436_vm1 = vcmp.eq.s32.totalorder %v2918_v41, %v2910_v37 }
  0xe0   :  { %vm87_vm3 = vcmp.eq.s32.totalorder %v2931_v10, %v2625_v24  ;;  %v1880_v35 = vsel %vm260_vm13, 1.0, %v2246_v12  ;;  %v1881_v22 = vsel %vm261_vm14, 1.0, %v2246_v12  ;;  %vm270_vm4 = vcmp.eq.s32.totalorder %v2918_v41, %v2847_v46 }
  0xe1   :  { %v2998_v7 = vpop.permute.xlu1 %562  ;;  %v3000_v15 = vpop.permute.xlu0 %395  ;;  %vm271_vm5 = vcmp.eq.s32.totalorder %v2931_v10, %v2847_v46  ;;  %vm255_vm7 = vcmp.eq.s32.totalorder %v2931_v10, %v2768_v50  ;;  %vm788_vm8 = vcmp.eq.s32.totalorder %v2918_v41, %v2892_v28  ;;  %vm789_vm9 = vcmp.eq.s32.totalorder %v2931_v10, %v2892_v28 }
  0xe2   :  { %2199 = vset.pattern.permute.xlu1 %v4193_v31  ;;  %v1876_v46 = vsel %vm256_vm15, 1.0, %v2246_v12  ;;  %v356_v28 = vadd.f32 %v1880_v35, %v1848_v51  ;;  %v357_v61 = vadd.f32 %v1881_v22, %v1849_v52  ;;  %v1890_v30 = vsel %vm270_vm4, 1.0, %v2246_v12 }
  0xe3   :  { %1099 = vperm.xlu1 %2199, %v2294_v6   ;;  %v1977_v42 = vsel %vm789_vm9, 1.0, %v2246_v12  ;;  %vm259_vm4 = vcmp.eq.s32.totalorder %v2931_v10, %v2786_v53 }
  0xe5   :  { %v3004_v1 = vpop.permute.xlu0 %401 }
  0xe6   :  { %4205 = vst [vmem:[#allocation21_spill] sm:$0xff] %v3004_v1  ;;  %v3006_v26 = vpop.permute.xlu1 %738  ;;  %v1912_v1 = vsel %vm436_vm1, 1.0, %v2246_v12 }
  0xe7   :  { %2200 = vset.pattern.permute.xlu1 %v4195_v36  ;;  %v532_v18 = vadd.f32 %v1912_v1, %v356_v28 }
  0xe8   :  { %577 = vperm.xlu1 %2200, %v2306_v8  }
  0xe9   :  { %v3010_v40 = vpop.permute.xlu0 %407 }
  0xea   :  { %vm447_vm11 = vcmp.eq.s32.totalorder %v2931_v10, %v3010_v40 }
  0xeb   :  { %v3012_v9 = vpop.permute.xlu1 %1087 }
  0xec   :  { %595 = vperm.xlu1 %2200, %v2342_v14  }
  0xed   :  { %v3015_v56 = vpop.permute.xlu0 %413 }
  0xee   :  { %4206 = vst [vmem:[#allocation22_spill] sm:$0xff] %v3015_v56  ;;  %v1976_v56 = vsel %vm788_vm8, 1.0, %v2246_v12 }
  0xf0   :  { %2201 = vset.pattern.permute.xlu1 %v4197_v5  ;;  %v3018_v45 = vpop.permute.xlu1 %583 }
  0xf1   :  { %944 = vperm.xlu1 %2201, %v2325_v11   ;;  %v3021_v29 = vpop.permute.xlu0 %425  ;;  %v3038_v11 = vsel %vm82_vm0, 1.0, %v2246_v12  ;;  %vm254_vm0 = vcmp.eq.s32.totalorder %v2918_v41, %v2768_v50  ;;  %vm622_vm14 = vcmp.eq.s32.totalorder %v2918_v41, %v3018_v45  ;;  %vm623_vm15 = vcmp.eq.s32.totalorder %v2931_v10, %v3018_v45 }
  0xf2   :  { %4207 = vst [vmem:[#allocation23_spill] sm:$0xff] %v3021_v29  ;;  %v3078_v29 = vsel %vm80_vm6, 1.0, %v2246_v12  ;;  %vm257_vm6 = vcmp.eq.s32.totalorder %v2931_v10, %v2766_v49  ;;  %v1874_v43 = vsel %vm254_vm0, 1.0, %v2246_v12  ;;  %v1879_v50 = vsel %vm259_vm4, 1.0, %v2246_v12 }
  0xf3   :  { %vm606_vm4 = vcmp.eq.s32.totalorder %v2918_v41, %v2928_v44 }
  0xf5   :  { %2202 = vset.pattern.permute.xlu1 %v4187_v4  ;;  %v3026_v47 = vpop.permute.xlu1 %914 }
  0xf6   :  { %1275 = vperm.xlu1 %2202, %v2294_v6   ;;  %v3033_v14 = vpop.permute.xlu0 %1263  ;;  %v3050_v6 = vsel %vm78_vm2, 1.0, %v2246_v12  ;;  %vm437_vm2 = vcmp.eq.s32.totalorder %v2931_v10, %v2910_v37 }
  0xf7   :  { %v350_v49 = vadd.f32 %v1874_v43, %v3050_v6  ;;  %v3254_v6 = vld [vmem:[%s4144_s0 + $0x68] sm:$0xff] }
  0xfa   :  { %2203 = vset.pattern.permute.xlu1 %v4200_v16  ;;  %v3065_v63 = vpop.permute.xlu1 %741  ;;  %v3067_v0 = vpop.permute.xlu0 %1287  ;;  %v1891_v16 = vsel %vm271_vm5, 1.0, %v2246_v12  ;;  %vm262_vm5 = vcmp.eq.s32.totalorder %v2918_v41, %v2806_v57 }
  0xfb   :  { %422 = vperm.xlu1 %2203, %v2337_v13   ;;  %v3101_v13 = vsel %vm86_vm10, 1.0, %v2246_v12  ;;  %vm446_vm10 = vcmp.eq.s32.totalorder %v2918_v41, %v3010_v40  ;;  %v1923_v40 = vsel %vm447_vm11, 1.0, %v2246_v12  ;;  %vm1326_vm8 = vcmp.eq.s32.totalorder %v2918_v41, %v3067_v0 }
  0xfc   :  { %v1922_v1 = vsel %vm446_vm10, 1.0, %v2246_v12  ;;  %vm1327_vm9 = vcmp.eq.s32.totalorder %v2931_v10, %v3067_v0  ;;  %vm263_vm10 = vcmp.eq.s32.totalorder %v2931_v10, %v2806_v57  ;;  %vm430_vm11 = vcmp.eq.s32.totalorder %v2918_v41, %v2890_v27 }
  0xfd   :  { %v1883_v0 = vsel %vm263_vm10, 1.0, %v2246_v12  ;;  %vm439_vm10 = vcmp.eq.s32.totalorder %v2931_v10, %v3000_v15 }
  0xfe   :  { %v760_v23 = vpop.permute.xlu1 %759  ;;  %v3119_v2 = vpop.permute.xlu0 %1272 }
  0xff   :  { %2204 = vset.pattern.permute.xlu1 %v4190_v3  ;;  %vm798_vm0 = vcmp.eq.s32.totalorder %v2918_v41, %v760_v23  ;;  %vm799_vm1 = vcmp.eq.s32.totalorder %v2931_v10, %v760_v23 }
 0x100   :  { %753 = vperm.xlu1 %2204, %v2306_v8   ;;  %v1913_v8 = vsel %vm437_vm2, 1.0, %v2246_v12  ;;  %vm258_vm2 = vcmp.eq.s32.totalorder %v2918_v41, %v2786_v53  ;;  %v1986_v45 = vsel %vm798_vm0, 1.0, %v2246_v12  ;;  %vm435_vm0 = vcmp.eq.s32.totalorder %v2931_v10, %v2900_v32 }
 0x101   :  { %v533_v51 = vadd.f32 %v1913_v8, %v357_v61  ;;  %v3177_v61 = vld [vmem:[%s4144_s0 + $0x28] sm:$0xff] }
 0x102   :  { %v3157_v33 = vpop.permute.xlu0 %1293 }
 0x103   :  { %4208 = vst [vmem:[#allocation24_spill] sm:$0xff] %v3157_v33  ;;  %v569_v37 = vpop.permute.xlu1 %568  ;;  %v367_v33 = vadd.f32 %v1891_v16, %v1859_v55  ;;  %v3203_v55 = vld [vmem:[%s4144_s0 + $0x58] sm:$0xff] }
 0x104   :  { %vm612_vm12 = vcmp.eq.s32.totalorder %v2918_v41, %v569_v37  ;;  %vm613_vm13 = vcmp.eq.s32.totalorder %v2931_v10, %v569_v37  ;;  %2206 = vset.pattern.permute.xlu1 %v4193_v31  ;;  %v366_v37 = vadd.f32 %v1890_v30, %v1858_v38  ;;  %v1955_v30 = vsel %vm623_vm15, 1.0, %v2246_v12 }
 0x105   :  { %v1944_v22 = vsel %vm612_vm12, 1.0, %v2246_v12  ;;  %v1945_v52 = vsel %vm613_vm13, 1.0, %v2246_v12  ;;  %1102 = vperm.xlu1 %2206, %v3177_v61   ;;  %v543_v38 = vadd.f32 %v1923_v40, %v367_v33  ;;  %v1877_v33 = vsel %vm257_vm6, 1.0, %v2246_v12 }
 0x106   :  { %v708_v35 = vadd.f32 %v1944_v22, %v532_v18  ;;  %v709_v8 = vadd.f32 %v1945_v52, %v533_v51  ;;  %v3182_v28 = vpop.permute.xlu0 %1299  ;;  %v1954_v18 = vsel %vm622_vm14, 1.0, %v2246_v12  ;;  %v542_v16 = vadd.f32 %v1922_v1, %v366_v37 }
 0x107   :  { %v3186_v54 = vpop.permute.xlu1 %586  ;;  %v1851_v22 = vsel %vm87_vm3, 1.0, %v2246_v12  ;;  %v1987_v52 = vsel %vm799_vm1, 1.0, %v2246_v12  ;;  %v3221_v1 = vadd.f32 %v1876_v46, %v3078_v29  ;;  %v719_v24 = vadd.f32 %v1955_v30, %v543_v38 }
 0x108   :  { %v3206_v23 = vadd.f32 %v1976_v56, %v708_v35  ;;  %v3208_v51 = vadd.f32 %v1977_v42, %v709_v8  ;;  %v1875_v42 = vsel %vm255_vm7, 1.0, %v2246_v12  ;;  %v718_v56 = vadd.f32 %v1954_v18, %v542_v16 }
 0x109   :  { %1120 = vperm.xlu1 %2206, %v3203_v55   ;;  %vm96_vm3 = vcmp.eq.s32.totalorder %v2918_v41, %v2680_v34  ;;  %v1878_v29 = vsel %vm258_vm2, 1.0, %v2246_v12  ;;  %v895_v8 = vadd.f32 %v1987_v52, %v719_v24  ;;  %v1882_v37 = vsel %vm262_vm5, 1.0, %v2246_v12 }
 0x10a   :  { %v894_v35 = vadd.f32 %v1986_v45, %v718_v56  ;;  %vm431_vm12 = vcmp.eq.s32.totalorder %v2931_v10, %v2890_v27  ;;  %v2082_v38 = vsel %vm1326_vm8, 1.0, %v2246_v12  ;;  %v2083_v24 = vsel %vm1327_vm9, 1.0, %v2246_v12 }
 0x10b   :  { %v3227_v40 = vpop.permute.xlu0 %1090  ;;  %vm434_vm15 = vcmp.eq.s32.totalorder %v2918_v41, %v2900_v32  ;;  %v1907_v57 = vsel %vm431_vm12, 1.0, %v2246_v12  ;;  %vm432_vm1 = vcmp.eq.s32.totalorder %v2918_v41, %v2995_v21  ;;  %vm433_vm2 = vcmp.eq.s32.totalorder %v2931_v10, %v2995_v21 }
 0x10c   :  { %v936_v46 = vpop.permute.xlu1 %935  ;;  %vm607_vm5 = vcmp.eq.s32.totalorder %v2931_v10, %v2928_v44  ;;  %v1908_v44 = vsel %vm432_vm1, 1.0, %v2246_v12  ;;  %vm609_vm8 = vcmp.eq.s32.totalorder %v2931_v10, %v2998_v7  ;;  %vm438_vm9 = vcmp.eq.s32.totalorder %v2918_v41, %v3000_v15 }
 0x10d   :  { %vm974_vm6 = vcmp.eq.s32.totalorder %v2918_v41, %v936_v46  ;;  %vm975_vm7 = vcmp.eq.s32.totalorder %v2931_v10, %v936_v46  ;;  %2208 = vset.pattern.permute.xlu1 %v4195_v36  ;;  %vm783_vm12 = vcmp.eq.s32.totalorder %v2931_v10, %v2988_v62  ;;  %v1941_v15 = vsel %vm609_vm8, 1.0, %v2246_v12 }
 0x10e   :  { %v2018_v43 = vsel %vm974_vm6, 1.0, %v2246_v12  ;;  %v2019_v53 = vsel %vm975_vm7, 1.0, %v2246_v12  ;;  %598 = vperm.xlu1 %2208, %v3254_v6   ;;  %vm610_vm6 = vcmp.eq.s32.totalorder %v2918_v41, %v2944_v20  ;;  %vm608_vm7 = vcmp.eq.s32.totalorder %v2918_v41, %v2998_v7 }
 0x10f   :  { %v1070_v18 = vadd.f32 %v2018_v43, %v894_v35  ;;  %v1112_v30 = vpop.permute.xlu0 %1111  ;;  %v1071_v16 = vadd.f32 %v2019_v53, %v895_v8  ;;  %v353_v8 = vadd.f32 %v1877_v33, %v3082_v60  ;;  %v351_v43 = vadd.f32 %v1875_v42, %v3073_v48 }
 0x110   :  { %vm1150_vm13 = vcmp.eq.s32.totalorder %v2918_v41, %v1112_v30  ;;  %vm1151_vm14 = vcmp.eq.s32.totalorder %v2931_v10, %v1112_v30  ;;  %v1906_v53 = vsel %vm430_vm11, 1.0, %v2246_v12  ;;  %v354_v48 = vadd.f32 %v1878_v29, %v3038_v11 }
 0x111   :  { %v2050_v45 = vsel %vm1150_vm13, 1.0, %v2246_v12  ;;  %v2051_v52 = vsel %vm1151_vm14, 1.0, %v2246_v12  ;;  %v3269_v56 = vpop.permute.xlu1 %1266  ;;  %v355_v30 = vadd.f32 %v1879_v50, %v3047_v58  ;;  %v1911_v11 = vsel %vm435_vm0, 1.0, %v2246_v12 }
 0x112   :  { %v1246_v46 = vadd.f32 %v2050_v45, %v1070_v18  ;;  %2209 = vset.pattern.permute.xlu1 %v4197_v5  ;;  %v1247_v35 = vadd.f32 %v2051_v52, %v1071_v16  ;;  %v3293_v18 = vld [vmem:[%s4144_s0 + $0x30] sm:$0xff]  ;;  %v358_v16 = vadd.f32 %v1882_v37, %v3101_v13  ;;  %v1910_v45 = vsel %vm434_vm15, 1.0, %v2246_v12 }
 0x113   :  { %929 = vperm.xlu1 %2209, %v3293_v18   ;;  %v3296_v60 = vpop.permute.xlu0 %1096  ;;  %v359_v29 = vadd.f32 %v1883_v0, %v1851_v22  ;;  %v526_v52 = vadd.f32 %v1906_v53, %v350_v49  ;;  %v3323_v58 = vsel %vm96_vm3, 1.0, %v2246_v12  ;;  %v527_v13 = vadd.f32 %v1907_v57, %v351_v43 }
 0x114   :  { %v1423_v33 = vadd.f32 %v2083_v24, %v1247_v35  ;;  %v1422_v42 = vadd.f32 %v2082_v38, %v1246_v46  ;;  %v530_v22 = vadd.f32 %v1910_v45, %v354_v48  ;;  %v531_v49 = vadd.f32 %v1911_v11, %v355_v30 }
 0x115   :  { %vm611_vm3 = vcmp.eq.s32.totalorder %v2931_v10, %v2944_v20  ;;  %v1909_v50 = vsel %vm433_vm2, 1.0, %v2246_v12  ;;  %v1938_v20 = vsel %vm606_vm4, 1.0, %v2246_v12  ;;  %v1942_v37 = vsel %vm610_vm6, 1.0, %v2246_v12 }
 0x116   :  { %v3317_v27 = vpop.permute.xlu1 %762  ;;  %1614 = vmatprep.mubr.f32.mxu1 %v1423_v33  ;;  %v1943_v21 = vsel %vm611_vm3, 1.0, %v2246_v12  ;;  %vm782_vm11 = vcmp.eq.s32.totalorder %v2918_v41, %v2988_v62  ;;  %v528_v24 = vadd.f32 %v1908_v44, %v3221_v1  ;;  %v529_v46 = vadd.f32 %v1909_v50, %v353_v8  ;;  %v3401_v62 = vld [vmem:[%s4144_s0 + $0x38] sm:$0xff] }
 0x117   :  { %2210 = vset.pattern.permute.xlu1 %v4187_v4  ;;  %1615 = vmatmul.mubr.f32.vlgmr.msra.gmra.mxu1 %v1422_v42  ;;  %v3330_v32 = vpop.permute.xlu0 %1117  ;;  %v1940_v35 = vsel %vm608_vm7, 1.0, %v2246_v12  ;;  %v1914_v43 = vsel %vm438_vm9, 1.0, %v2246_v12  ;;  %v1915_v0 = vsel %vm439_vm10, 1.0, %v2246_v12  ;;  %vm784_vm13 = vcmp.eq.s32.totalorder %v2918_v41, %v3006_v26 }
 0x118   :  { %1278 = vperm.xlu1 %2210, %v3177_v61   ;;  %v1939_v61 = vsel %vm607_vm5, 1.0, %v2246_v12  ;;  %vm785_vm14 = vcmp.eq.s32.totalorder %v2931_v10, %v3006_v26  ;;  %v702_v53 = vadd.f32 %v1938_v20, %v526_v52  ;;  %v3375_v1 = vadd.f32 %v1942_v37, %v530_v22 }
 0x119   :  { %v703_v48 = vadd.f32 %v1939_v61, %v527_v13  ;;  %v3377_v8 = vadd.f32 %v1943_v21, %v531_v49  ;;  %v1971_v57 = vsel %vm783_vm12, 1.0, %v2246_v12  ;;  %v704_v33 = vadd.f32 %v1940_v35, %v528_v24 }
 0x11a   :  { %v705_v42 = vadd.f32 %v1941_v15, %v529_v46  ;;  %v534_v26 = vadd.f32 %v1914_v43, %v358_v16  ;;  %v535_v45 = vadd.f32 %v1915_v0, %v359_v29  ;;  %v1972_v11 = vsel %vm784_vm13, 1.0, %v2246_v12 }
 0x11b   :  { %v3361_v7 = vpop.permute.xlu1 %1093  ;;  %v3363_v38 = vpop.permute.xlu0 %1105  ;;  %v1973_v52 = vsel %vm785_vm14, 1.0, %v2246_v12  ;;  %vm1134_vm15 = vcmp.eq.s32.totalorder %v2918_v41, %v3012_v9  ;;  %vm1135_vm0 = vcmp.eq.s32.totalorder %v2931_v10, %v3012_v9  ;;  %vm960_vm4 = vcmp.eq.s32.totalorder %v2918_v41, %v3026_v47 }
 0x11c   :  { %1296 = vperm.xlu1 %2210, %v3203_v55   ;;  %v1970_v55 = vsel %vm782_vm11, 1.0, %v2246_v12  ;;  %vm961_vm5 = vcmp.eq.s32.totalorder %v2931_v10, %v3026_v47  ;;  %v879_v49 = vadd.f32 %v1971_v57, %v703_v48  ;;  %v880_v20 = vadd.f32 %v1972_v11, %v704_v33 }
 0x11d   :  { %v878_v22 = vadd.f32 %v1970_v55, %v702_v53  ;;  %v881_v61 = vadd.f32 %v1973_v52, %v705_v42  ;;  %v2034_v37 = vsel %vm1134_vm15, 1.0, %v2246_v12  ;;  %v2035_v47 = vsel %vm1135_vm0, 1.0, %v2246_v12 }
 0x11e   :  { %v2004_v24 = vsel %vm960_vm4, 1.0, %v2246_v12  ;;  %v2005_v46 = vsel %vm961_vm5, 1.0, %v2246_v12  ;;  %vm786_vm6 = vcmp.eq.s32.totalorder %v2918_v41, %v3065_v63  ;;  %vm787_vm3 = vcmp.eq.s32.totalorder %v2931_v10, %v3065_v63 }
 0x11f   :  { %v3387_v30 = vpop.permute.xlu0 %1108  ;;  %vm1136_vm7 = vcmp.eq.s32.totalorder %v2918_v41, %v3227_v40  ;;  %vm1137_vm8 = vcmp.eq.s32.totalorder %v2931_v10, %v3227_v40  ;;  %vm1310_vm11 = vcmp.eq.s32.totalorder %v2918_v41, %v3033_v14  ;;  %vm1311_vm12 = vcmp.eq.s32.totalorder %v2931_v10, %v3033_v14  ;;  %v2235_v40 = vld [vmem:[%s4144_s0 + $0x60] sm:$0xff] }
 0x120   :  { %2212 = vset.pattern.permute.xlu1 %v4190_v3  ;;  %v572_v13 = vpop.permute.xlu1 %571  ;;  %vm97_vm13 = vcmp.eq.s32.totalorder %v2931_v10, %v2680_v34  ;;  %v1056_v43 = vadd.f32 %v2004_v24, %v880_v20  ;;  %v1057_v0 = vadd.f32 %v2005_v46, %v881_v61  ;;  %v1975_v53 = vsel %vm787_vm3, 1.0, %v2246_v12 }
 0x121   :  { %vm614_vm1 = vcmp.eq.s32.totalorder %v2918_v41, %v572_v13  ;;  %vm615_vm2 = vcmp.eq.s32.totalorder %v2931_v10, %v572_v13  ;;  %756 = vperm.xlu1 %2212, %v3401_v62   ;;  %vm264_vm14 = vcmp.eq.s32.totalorder %v2918_v41, %v2808_v19  ;;  %vm265_vm15 = vcmp.eq.s32.totalorder %v2931_v10, %v2808_v19 }
 0x122   :  { %v1946_v16 = vsel %vm614_vm1, 1.0, %v2246_v12  ;;  %v1947_v29 = vsel %vm615_vm2, 1.0, %v2246_v12  ;;  %v1974_v55 = vsel %vm786_vm6, 1.0, %v2246_v12  ;;  %v2036_v57 = vsel %vm1136_vm7, 1.0, %v2246_v12 }
 0x123   :  { %v3410_v44 = vadd.f32 %v1946_v16, %v534_v26  ;;  %v3412_v50 = vadd.f32 %v1947_v29, %v535_v45  ;;  %v2037_v33 = vsel %vm1137_vm8, 1.0, %v2246_v12  ;;  %v2066_v63 = vsel %vm1310_vm11, 1.0, %v2246_v12 }
 0x124   :  { %v3418_v21 = vpop.permute.xlu1 %589  ;;  %v912_v35 = vpop.permute.xlu0 %911  ;;  %vm1313_vm0 = vcmp.eq.s32.totalorder %v2931_v10, %v3269_v56  ;;  %v883_v52 = vadd.f32 %v1975_v53, %v3377_v8  ;;  %vm1312_vm2 = vcmp.eq.s32.totalorder %v2918_v41, %v3269_v56  ;;  %v2067_v16 = vsel %vm1311_vm12, 1.0, %v2246_v12 }
 0x125   :  { %774 = vperm.xlu1 %2212, %v3254_v6   ;;  %vm958_vm9 = vcmp.eq.s32.totalorder %v2918_v41, %v912_v35  ;;  %vm959_vm10 = vcmp.eq.s32.totalorder %v2931_v10, %v912_v35  ;;  %vm98_vm4 = vcmp.eq.s32.totalorder %v2918_v41, %v2704_v39  ;;  %v882_v29 = vadd.f32 %v1974_v55, %v3375_v1 }
 0x126   :  { %v2002_v9 = vsel %vm958_vm9, 1.0, %v2246_v12  ;;  %v2003_v15 = vsel %vm959_vm10, 1.0, %v2246_v12  ;;  %v2069_v8 = vsel %vm1313_vm0, 1.0, %v2246_v12  ;;  %vm1139_vm6 = vcmp.eq.s32.totalorder %v2931_v10, %v3361_v7 }
 0x127   :  { %v1054_v48 = vadd.f32 %v2002_v9, %v878_v22  ;;  %v1055_v42 = vadd.f32 %v2003_v15, %v879_v49  ;;  %v1232_v22 = vadd.f32 %v2036_v57, %v1056_v43  ;;  %v1233_v49 = vadd.f32 %v2037_v33, %v1057_v0 }
 0x128   :  { %v918_v26 = vpop.permute.xlu0 %917  ;;  %v2068_v14 = vsel %vm1312_vm2, 1.0, %v2246_v12  ;;  %vm1141_vm8 = vcmp.eq.s32.totalorder %v2931_v10, %v3296_v60  ;;  %vm1140_vm9 = vcmp.eq.s32.totalorder %v2918_v41, %v3296_v60  ;;  %v2039_v9 = vsel %vm1139_vm6, 1.0, %v2246_v12 }
 0x129   :  { %2213 = vset.pattern.permute.xlu1 %v4193_v31  ;;  %v3463_v45 = vpop.permute.xlu1 %938  ;;  %v1230_v11 = vadd.f32 %v2034_v37, %v1054_v48  ;;  %vm963_vm1 = vcmp.eq.s32.totalorder %v2931_v10, %v918_v26  ;;  %vm962_vm5 = vcmp.eq.s32.totalorder %v2918_v41, %v918_v26  ;;  %v1231_v61 = vadd.f32 %v2035_v47, %v1055_v42  ;;  %v3501_v47 = vld [vmem:[%s4144_s0 + $0x70] sm:$0xff] }
 0x12a   :  { %1123 = vperm.xlu1 %2213, %v2235_v40   ;;  %v2007_v13 = vsel %vm963_vm1, 1.0, %v2246_v12  ;;  %v2006_v24 = vsel %vm962_vm5, 1.0, %v2246_v12  ;;  %v1409_v15 = vadd.f32 %v2069_v8, %v1233_v49  ;;  %v2041_v55 = vsel %vm1141_vm8, 1.0, %v2246_v12  ;;  %v4209_v8 = vld [vmem:[#allocation8_spill] sm:$0xff] }
 0x12b   :  { %v1059_v56 = vadd.f32 %v2007_v13, %v883_v52  ;;  %v1406_v37 = vadd.f32 %v2066_v63, %v1230_v11  ;;  %v1407_v35 = vadd.f32 %v2067_v16, %v1231_v61  ;;  %vm1138_vm11 = vcmp.eq.s32.totalorder %v2918_v41, %v3361_v7  ;;  %v4210_v61 = vld [vmem:[#allocation15_spill] sm:$0xff] }
 0x12c   :  { %v921_v20 = vpop.permute.xlu0 %920  ;;  %v1058_v57 = vadd.f32 %v2006_v24, %v882_v29  ;;  %v1861_v33 = vsel %vm97_vm13, 1.0, %v2246_v12  ;;  %vm99_vm0 = vcmp.eq.s32.totalorder %v2931_v10, %v2704_v39  ;;  %vm1317_vm1 = vcmp.eq.s32.totalorder %v2931_v10, %v3119_v2 }
 0x12d   :  { %vm964_vm3 = vcmp.eq.s32.totalorder %v2918_v41, %v921_v20  ;;  %vm965_vm7 = vcmp.eq.s32.totalorder %v2931_v10, %v921_v20  ;;  %1566 = vmatprep.mubr.f32.mxu0 %v1407_v35  ;;  %v1235_v53 = vadd.f32 %v2039_v9, %v1059_v56  ;;  %v1884_v26 = vsel %vm264_vm14, 1.0, %v2246_v12 }
 0x12e   :  { %2214 = vset.pattern.permute.xlu1 %v4195_v36  ;;  %v1270_v1 = vpop.permute.xlu1 %1269  ;;  %v2009_v46 = vsel %vm965_vm7, 1.0, %v2246_v12  ;;  %v2008_v43 = vsel %vm964_vm3, 1.0, %v2246_v12  ;;  %1567 = vmatmul.mubr.f32.vlgmr.msra.gmra.mxu0 %v1406_v37  ;;  %v1885_v34 = vsel %vm265_vm15, 1.0, %v2246_v12  ;;  %v1408_v11 = vadd.f32 %v2068_v14, %v1232_v22  ;;  %v4211_v14 = vld [vmem:[#allocation16_spill] sm:$0xff]  ;;  %v4213_v37 = vld [vmem:[#allocation13_spill] sm:$0xff] }
 0x12f   :  { %601 = vperm.xlu1 %2214, %v3501_v47   ;;  %vm1315_vm10 = vcmp.eq.s32.totalorder %v2931_v10, %v1270_v1  ;;  %v1061_v0 = vadd.f32 %v2009_v46, %v3208_v51  ;;  %vm1314_vm12 = vcmp.eq.s32.totalorder %v2918_v41, %v1270_v1  ;;  %1572 = vmatprep.mubr.f32.mxu0 %v1409_v15  ;;  %v2040_v40 = vsel %vm1140_vm9, 1.0, %v2246_v12  ;;  %v4212_v1 = vld [vmem:[#allocation22_spill] sm:$0xff] }
 0x130   :  { %v2071_v48 = vsel %vm1315_vm10, 1.0, %v2246_v12  ;;  %v1060_v63 = vadd.f32 %v2008_v43, %v3206_v23  ;;  %v2038_v52 = vsel %vm1138_vm11, 1.0, %v2246_v12  ;;  %v2070_v19 = vsel %vm1314_vm12, 1.0, %v2246_v12 }
 0x131   :  { %v1411_v51 = vadd.f32 %v2071_v48, %v1235_v53  ;;  %v1237_v13 = vadd.f32 %v2041_v55, %v1061_v0  ;;  %vm272_vm13 = vcmp.eq.s32.totalorder %v2918_v41, %v2850_v17  ;;  %vm1316_vm14 = vcmp.eq.s32.totalorder %v2918_v41, %v3119_v2 }
 0x132   :  { %v2073_v23 = vsel %vm1317_vm1, 1.0, %v2246_v12  ;;  %v1234_v60 = vadd.f32 %v2038_v52, %v1058_v57  ;;  %1573 = vmatmul.mubr.f32.gmra.mxu0 %v1408_v11  ;;  %v1862_v7 = vsel %vm98_vm4, 1.0, %v2246_v12  ;;  %v1863_v16 = vsel %vm99_vm0, 1.0, %v2246_v12 }
 0x133   :  { %2215 = vset.pattern.permute.xlu1 %v4197_v5  ;;  %v3527_v42 = vpop.permute.xlu1 %747  ;;  %v360_v29 = vadd.f32 %v1884_v26, %v3085_v25  ;;  %v361_v22 = vadd.f32 %v1885_v34, %v3095_v59  ;;  %1578 = vmatprep.mubr.f32.mxu0 %v1411_v51  ;;  %vm273_vm15 = vcmp.eq.s32.totalorder %v2931_v10, %v2850_v17  ;;  %v1892_v39 = vsel %vm272_vm13, 1.0, %v2246_v12  ;;  %v3618_v51 = vld [vmem:[%s4144_s0 + $0x78] sm:$0xff] }
 0x134   :  { %950 = vperm.xlu1 %2215, %v3254_v6   ;;  %vm274_vm2 = vcmp.eq.s32.totalorder %v2918_v41, %v4209_v8  ;;  %v1236_v56 = vadd.f32 %v2040_v40, %v1060_v63  ;;  %v1410_v20 = vadd.f32 %v2070_v19, %v1234_v60  ;;  %vm275_vm4 = vcmp.eq.s32.totalorder %v2931_v10, %v4209_v8  ;;  %v4215_v60 = vld [vmem:[#allocation24_spill] sm:$0xff] }
 0x135   :  { %v2072_v25 = vsel %vm1316_vm14, 1.0, %v2246_v12  ;;  %v1413_v59 = vadd.f32 %v2073_v23, %v1237_v13  ;;  %vm440_vm5 = vcmp.eq.s32.totalorder %v2918_v41, %v4210_v61  ;;  %vm441_vm6 = vcmp.eq.s32.totalorder %v2931_v10, %v4210_v61 }
 0x136   :  { %vm448_vm3 = vcmp.eq.s32.totalorder %v2918_v41, %v4211_v14  ;;  %vm449_vm7 = vcmp.eq.s32.totalorder %v2931_v10, %v4211_v14  ;;  %1579 = vmatmul.mubr.f32.gmra.mxu0 %v1410_v20  ;;  %v1893_v17 = vsel %vm273_vm15, 1.0, %v2246_v12  ;;  %v1894_v2 = vsel %vm274_vm2, 1.0, %v2246_v12 }
 0x137   :  { %v3568_v49 = vpop.permute.xlu1 %765  ;;  %vm450_vm8 = vcmp.eq.s32.totalorder %v2918_v41, %v4212_v1  ;;  %vm451_vm9 = vcmp.eq.s32.totalorder %v2931_v10, %v4212_v1  ;;  %1584 = vmatprep.mubr.f32.mxu0 %v1413_v59  ;;  %vm792_vm10 = vcmp.eq.s32.totalorder %v2918_v41, %v4213_v37  ;;  %vm793_vm11 = vcmp.eq.s32.totalorder %v2931_v10, %v4213_v37 }
 0x138   :  { %2216 = vset.pattern.permute.xlu1 %v4187_v4  ;;  %v1412_v24 = vadd.f32 %v2072_v25, %v1236_v56  ;;  %v1916_v35 = vsel %vm440_vm5, 1.0, %v2246_v12  ;;  %v1917_v9 = vsel %vm441_vm6, 1.0, %v2246_v12  ;;  %v1924_v15 = vsel %vm448_vm3, 1.0, %v2246_v12 }
 0x139   :  { %1281 = vperm.xlu1 %2216, %v3293_v18   ;;  %v1895_v18 = vsel %vm275_vm4, 1.0, %v2246_v12  ;;  %v1925_v43 = vsel %vm449_vm7, 1.0, %v2246_v12  ;;  %v4214_v0 = vmov 2   ;;  %v368_v53 = vadd.f32 %v1892_v39, %v3323_v58 }
 0x13a   :  { %v369_v48 = vadd.f32 %v1893_v17, %v1861_v33  ;;  %v1926_v55 = vsel %vm450_vm8, 1.0, %v2246_v12  ;;  %v1927_v57 = vsel %vm451_vm9, 1.0, %v2246_v12  ;;  %1585 = vmatmul.mubr.f32.gmra.mxu0 %v1412_v24  ;;  %v370_v26 = vadd.f32 %v1894_v2, %v1862_v7 }
 0x13b   :  { %v371_v34 = vadd.f32 %v1895_v18, %v1863_v16  ;;  %v1980_v58 = vsel %vm792_vm10, 1.0, %v2246_v12  ;;  %v1981_v33 = vsel %vm793_vm11, 1.0, %v2246_v12  ;;  %v536_v63 = vadd.f32 %v1916_v35, %v360_v29 }
 0x13c   :  { %v3605_v46 = vpop.permute.xlu1 %1114  ;;  %v537_v11 = vadd.f32 %v1917_v9, %v361_v22  ;;  %v544_v40 = vadd.f32 %v1924_v15, %v368_v53  ;;  %v545_v52 = vadd.f32 %v1925_v43, %v369_v48  ;;  %v546_v13 = vadd.f32 %v1926_v55, %v370_v26 }
 0x13d   :  { %2218 = vset.pattern.permute.xlu1 %v4214_v0  ;;  %v547_v19 = vadd.f32 %v1927_v57, %v371_v34  ;;  %vm624_vm12 = vcmp.eq.s32.totalorder %v2918_v41, %v3186_v54  ;;  %vm625_vm0 = vcmp.eq.s32.totalorder %v2931_v10, %v3186_v54  ;;  %vm800_vm1 = vcmp.eq.s32.totalorder %v2918_v41, %v3317_v27 }
 0x13e   :  { %428 = vperm.xlu1 %2218, %v3618_v51   ;;  %vm801_vm13 = vcmp.eq.s32.totalorder %v2931_v10, %v3317_v27  ;;  %vm1330_vm2 = vcmp.eq.s32.totalorder %v2918_v41, %v4215_v60  ;;  %vm1331_vm4 = vcmp.eq.s32.totalorder %v2931_v10, %v4215_v60  ;;  %vm626_vm5 = vcmp.eq.s32.totalorder %v2918_v41, %v3418_v21 }
 0x13f   :  { %vm627_vm6 = vcmp.eq.s32.totalorder %v2931_v10, %v3418_v21  ;;  %v1957_v16 = vsel %vm625_vm0, 1.0, %v2246_v12  ;;  %v1988_v8 = vsel %vm800_vm1, 1.0, %v2246_v12  ;;  %v1989_v21 = vsel %vm801_vm13, 1.0, %v2246_v12 }
 0x140   :  { %vm802_vm3 = vcmp.eq.s32.totalorder %v2918_v41, %v3568_v49  ;;  %vm803_vm7 = vcmp.eq.s32.totalorder %v2931_v10, %v3568_v49  ;;  %v1958_v56 = vsel %vm626_vm5, 1.0, %v2246_v12  ;;  %v1959_v20 = vsel %vm627_vm6, 1.0, %v2246_v12 }
 0x141   :  { %v575_v23 = vpop.permute.xlu1 %574  ;;  %v721_v14 = vadd.f32 %v1957_v16, %v545_v52  ;;  %vm976_vm8 = vcmp.eq.s32.totalorder %v2918_v41, %v3463_v45  ;;  %vm977_vm9 = vcmp.eq.s32.totalorder %v2931_v10, %v3463_v45  ;;  %vm1154_vm10 = vcmp.eq.s32.totalorder %v2918_v41, %v3330_v32  ;;  %v4216_v16 = vld [vmem:[#allocation2_spill] sm:$0xff] }
 0x142   :  { %vm616_vm14 = vcmp.eq.s32.totalorder %v2918_v41, %v575_v23  ;;  %vm617_vm15 = vcmp.eq.s32.totalorder %v2931_v10, %v575_v23  ;;  %2219 = vset.pattern.permute.xlu1 %v4190_v3  ;;  %v1956_v3 = vsel %vm624_vm12, 1.0, %v2246_v12  ;;  %vm1155_vm11 = vcmp.eq.s32.totalorder %v2931_v10, %v3330_v32 }
 0x143   :  { %v1948_v54 = vsel %vm616_vm14, 1.0, %v2246_v12  ;;  %v1949_v7 = vsel %vm617_vm15, 1.0, %v2246_v12  ;;  %777 = vperm.xlu1 %2219, %v3501_v47   ;;  %v720_v61 = vadd.f32 %v1956_v3, %v544_v40  ;;  %v1990_v27 = vsel %vm802_vm3, 1.0, %v2246_v12 }
 0x144   :  { %v712_v29 = vadd.f32 %v1948_v54, %v536_v63  ;;  %v713_v22 = vadd.f32 %v1949_v7, %v537_v11  ;;  %v1991_v49 = vsel %vm803_vm7, 1.0, %v2246_v12  ;;  %v897_v2 = vadd.f32 %v1989_v21, %v721_v14 }
 0x145   :  { %v896_v17 = vadd.f32 %v1988_v8, %v720_v61  ;;  %v722_v1 = vadd.f32 %v1958_v56, %v546_v13  ;;  %v723_v18 = vadd.f32 %v1959_v20, %v547_v19  ;;  %v2020_v45 = vsel %vm976_vm8, 1.0, %v2246_v12  ;;  %v4219_v56 = vld [vmem:[#allocation4_spill] sm:$0xff]  ;;  %v4220_v20 = vld [vmem:[#allocation9_spill] sm:$0xff] }
 0x146   :  { %v3667_v39 = vadd.f32 %v1980_v58, %v712_v29  ;;  %v3669_v25 = vadd.f32 %v1981_v33, %v713_v22  ;;  %v3671_v59 = vpop.permute.xlu1 %923  ;;  %v2021_v37 = vsel %vm977_vm9, 1.0, %v2246_v12  ;;  %vm1152_vm12 = vcmp.eq.s32.totalorder %v2918_v41, %v3605_v46 }
 0x147   :  { %2221 = vset.pattern.permute.xlu1 %v4193_v31  ;;  %vm1153_vm0 = vcmp.eq.s32.totalorder %v2931_v10, %v3605_v46  ;;  %v898_v35 = vadd.f32 %v1990_v27, %v722_v1  ;;  %v899_v9 = vadd.f32 %v1991_v49, %v723_v18  ;;  %v2054_v15 = vsel %vm1154_vm10, 1.0, %v2246_v12 }
 0x148   :  { %1126 = vperm.xlu1 %2221, %v3254_v6   ;;  %v2055_v43 = vsel %vm1155_vm11, 1.0, %v2246_v12  ;;  %v2052_v53 = vsel %vm1152_vm12, 1.0, %v2246_v12  ;;  %v2053_v48 = vsel %vm1153_vm0, 1.0, %v2246_v12  ;;  %v2086_v32 = vsel %vm1330_vm2, 1.0, %v2246_v12 }
 0x149   :  { %v2087_v26 = vsel %vm1331_vm4, 1.0, %v2246_v12  ;;  %v1072_v34 = vadd.f32 %v2020_v45, %v896_v17  ;;  %vm90_vm2 = vcmp.eq.s32.totalorder %v2918_v41, %v4216_v16  ;;  %vm91_vm4 = vcmp.eq.s32.totalorder %v2931_v10, %v4216_v16 }
 0x14a   :  { %v942_v24 = vpop.permute.xlu1 %941  ;;  %v1855_v22 = vsel %vm91_vm4, 1.0, %v2246_v12  ;;  %vm102_vm8 = vcmp.eq.s32.totalorder %v2918_v41, %v4219_v56  ;;  %vm103_vm9 = vcmp.eq.s32.totalorder %v2931_v10, %v4219_v56  ;;  %vm278_vm10 = vcmp.eq.s32.totalorder %v2918_v41, %v4220_v20 }
 0x14b   :  { %vm978_vm1 = vcmp.eq.s32.totalorder %v2918_v41, %v942_v24  ;;  %vm979_vm13 = vcmp.eq.s32.totalorder %v2931_v10, %v942_v24  ;;  %v1248_v11 = vadd.f32 %v2052_v53, %v1072_v34  ;;  %vm279_vm11 = vcmp.eq.s32.totalorder %v2931_v10, %v4220_v20 }
 0x14c   :  { %v2022_v0 = vsel %vm978_vm1, 1.0, %v2246_v12  ;;  %v2023_v46 = vsel %vm979_vm13, 1.0, %v2246_v12  ;;  %2222 = vset.pattern.permute.xlu1 %v4195_v36  ;;  %v1073_v36 = vadd.f32 %v2021_v37, %v897_v2  ;;  %v1866_v49 = vsel %vm102_vm8, 1.0, %v2246_v12 }
 0x14d   :  { %v1074_v55 = vadd.f32 %v2022_v0, %v898_v35  ;;  %v1075_v57 = vadd.f32 %v2023_v46, %v899_v9  ;;  %604 = vperm.xlu1 %2222, %v3618_v51   ;;  %v1867_v17 = vsel %vm103_vm9, 1.0, %v2246_v12  ;;  %v1898_v2 = vsel %vm278_vm10, 1.0, %v2246_v12 }
 0x14e   :  { %v1249_v40 = vadd.f32 %v2053_v48, %v1073_v36  ;;  %v1899_v1 = vsel %vm279_vm11, 1.0, %v2246_v12  ;;  %v4221_v48 = vld [vmem:[#allocation14_spill] sm:$0xff]  ;;  %vm791_vm4 = vcmp.eq.s32.totalorder %v2931_v10, %v3527_v42 }
 0x14f   :  { %v1250_v58 = vadd.f32 %v2054_v15, %v1074_v55  ;;  %v1251_v33 = vadd.f32 %v2055_v43, %v1075_v57  ;;  %v1291_v63 = vpop.permute.xlu1 %1290  ;;  %v374_v43 = vadd.f32 %v1898_v2, %v1866_v49  ;;  %v375_v0 = vadd.f32 %v1899_v1, %v1867_v17 }
 0x150   :  { %vm1328_vm14 = vcmp.eq.s32.totalorder %v2918_v41, %v1291_v63  ;;  %vm1329_vm15 = vcmp.eq.s32.totalorder %v2931_v10, %v1291_v63 }
 0x151   :  { %v2084_v52 = vsel %vm1328_vm14, 1.0, %v2246_v12  ;;  %v2085_v13 = vsel %vm1329_vm15, 1.0, %v2246_v12  ;;  %2223 = vset.pattern.permute.xlu1 %v4187_v4  ;;  %v1427_v19 = vadd.f32 %v2087_v26, %v1251_v33  ;;  %v1426_v23 = vadd.f32 %v2086_v32, %v1250_v58 }
 0x152   :  { %v1424_v60 = vadd.f32 %v2084_v52, %v1248_v11  ;;  %v1425_v54 = vadd.f32 %v2085_v13, %v1249_v40  ;;  %1284 = vperm.xlu1 %2223, %v3401_v62   ;;  %v4217_v62 = vld [vmem:[#allocation7_spill] sm:$0xff]  ;;  %vm806_vm14 = vcmp.eq.s32.totalorder %v2918_v41, %v4221_v48  ;;  %vm807_vm15 = vcmp.eq.s32.totalorder %v2931_v10, %v4221_v48 }
 0x153   :  { %vm266_vm5 = vcmp.eq.s32.totalorder %v2918_v41, %v4217_v62  ;;  %vm267_vm6 = vcmp.eq.s32.totalorder %v2931_v10, %v4217_v62  ;;  %v1994_v58 = vsel %vm806_vm14, 1.0, %v2246_v12 }
 0x154   :  { %v420_v7 = vpop.permute.xlu1 %419  ;;  %1620 = vmatprep.mubr.f32.mxu1 %v1425_v54  ;;  %v1886_v8 = vsel %vm266_vm5, 1.0, %v2246_v12  ;;  %v1887_v21 = vsel %vm267_vm6, 1.0, %v2246_v12 }
 0x155   :  { %1621 = vmatmul.mubr.f32.gmra.mxu1 %v1424_v60  ;;  %vm454_vm12 = vcmp.eq.s32.totalorder %v2918_v41, %v420_v7  ;;  %vm455_vm0 = vcmp.eq.s32.totalorder %v2931_v10, %v420_v7  ;;  %v4222_v7 = vld [vmem:[#allocation10_spill] sm:$0xff] }
 0x156   :  { %1302 = vperm.xlu1 %2223, %v3254_v6   ;;  %1626 = vmatprep.mubr.f32.mxu1 %v1427_v19  ;;  %v4218_v6 = vld [vmem:[#allocation21_spill] sm:$0xff]  ;;  %v1930_v24 = vsel %vm454_vm12, 1.0, %v2246_v12  ;;  %v1931_v35 = vsel %vm455_vm0, 1.0, %v2246_v12  ;;  %vm280_vm10 = vcmp.eq.s32.totalorder %v2918_v41, %v4222_v7  ;;  %vm281_vm11 = vcmp.eq.s32.totalorder %v2931_v10, %v4222_v7 }
 0x157   :  { %vm442_vm3 = vcmp.eq.s32.totalorder %v2918_v41, %v4218_v6  ;;  %vm443_vm7 = vcmp.eq.s32.totalorder %v2931_v10, %v4218_v6  ;;  %v550_v55 = vadd.f32 %v1930_v24, %v374_v43  ;;  %v551_v57 = vadd.f32 %v1931_v35, %v375_v0 }
 0x158   :  { %v1918_v61 = vsel %vm442_vm3, 1.0, %v2246_v12  ;;  %v1919_v14 = vsel %vm443_vm7, 1.0, %v2246_v12  ;;  %vm966_vm3 = vcmp.eq.s32.totalorder %v2918_v41, %v3671_v59  ;;  %vm967_vm7 = vcmp.eq.s32.totalorder %v2931_v10, %v3671_v59 }
 0x159   :  { %v3722_v3 = vpop.permute.xlu1 %768  ;;  %1627 = vmatmul.mubr.f32.gmra.mxu1 %v1426_v23  ;;  %v2010_v40 = vsel %vm966_vm3, 1.0, %v2246_v12  ;;  %v2011_v52 = vsel %vm967_vm7, 1.0, %v2246_v12  ;;  %vm1146_vm3 = vcmp.eq.s32.totalorder %v2918_v41, %v3363_v38  ;;  %vm1147_vm7 = vcmp.eq.s32.totalorder %v2931_v10, %v3363_v38 }
 0x15a   :  { %2225 = vset.pattern.permute.xlu1 %v4193_v31  ;;  %v2046_v0 = vsel %vm1146_vm3, 1.0, %v2246_v12  ;;  %v2047_v48 = vsel %vm1147_vm7, 1.0, %v2246_v12 }
 0x15b   :  { %1129 = vperm.xlu1 %2225, %v3501_v47   ;;  %v1854_v47 = vsel %vm90_vm2, 1.0, %v2246_v12  ;;  %vm790_vm2 = vcmp.eq.s32.totalorder %v2918_v41, %v3527_v42 }
 0x15c   :  { %v362_v27 = vadd.f32 %v1886_v8, %v1854_v47  ;;  %v1978_v33 = vsel %vm790_vm2, 1.0, %v2246_v12  ;;  %v1900_v47 = vsel %vm280_vm10, 1.0, %v2246_v12 }
 0x15d   :  { %v886_v13 = vadd.f32 %v1978_v33, %v3410_v44  ;;  %v4223_v44 = vld [vmem:[#allocation3_spill] sm:$0xff]  ;;  %v4225_v33 = vld [vmem:[#allocation20_spill] sm:$0xff] }
 0x15e   :  { %v3738_v29 = vpop.permute.xlu1 %1099  ;;  %v538_v45 = vadd.f32 %v1918_v61, %v362_v27 }
 0x15f   :  { %2226 = vset.pattern.permute.xlu1 %v4197_v5  ;;  %v363_v5 = vadd.f32 %v1887_v21, %v1855_v22  ;;  %vm1142_vm8 = vcmp.eq.s32.totalorder %v2918_v41, %v3738_v29  ;;  %vm1143_vm9 = vcmp.eq.s32.totalorder %v2931_v10, %v3738_v29  ;;  %v1062_v60 = vadd.f32 %v2010_v40, %v886_v13 }
 0x160   :  { %956 = vperm.xlu1 %2226, %v3618_v51   ;;  %v2042_v19 = vsel %vm1142_vm8, 1.0, %v2246_v12  ;;  %v2043_v23 = vsel %vm1143_vm9, 1.0, %v2246_v12  ;;  %v1901_v22 = vsel %vm281_vm11, 1.0, %v2246_v12  ;;  %vm804_vm8 = vcmp.eq.s32.totalorder %v2918_v41, %v3722_v3 }
 0x161   :  { %v539_v37 = vadd.f32 %v1919_v14, %v363_v5  ;;  %v1238_v62 = vadd.f32 %v2042_v19, %v1062_v60  ;;  %vm805_vm9 = vcmp.eq.s32.totalorder %v2931_v10, %v3722_v3 }
 0x163   :  { %v578_v18 = vpop.permute.xlu1 %577 }
 0x164   :  { %vm618_vm1 = vcmp.eq.s32.totalorder %v2918_v41, %v578_v18  ;;  %vm619_vm13 = vcmp.eq.s32.totalorder %v2931_v10, %v578_v18  ;;  %2228 = vset.pattern.permute.xlu1 %v4193_v31 }
 0x165   :  { %v1950_v9 = vsel %vm618_vm1, 1.0, %v2246_v12  ;;  %v1951_v15 = vsel %vm619_vm13, 1.0, %v2246_v12  ;;  %1132 = vperm.xlu1 %2228, %v3618_v51   ;;  %vm104_vm1 = vcmp.eq.s32.totalorder %v2918_v41, %v4223_v44  ;;  %vm105_vm13 = vcmp.eq.s32.totalorder %v2931_v10, %v4223_v44 }
 0x166   :  { %v3770_v46 = vadd.f32 %v1950_v9, %v538_v45  ;;  %v3772_v53 = vadd.f32 %v1951_v15, %v539_v37  ;;  %v1868_v56 = vsel %vm104_vm1, 1.0, %v2246_v12  ;;  %v1869_v20 = vsel %vm105_vm13, 1.0, %v2246_v12  ;;  %v927_v45 = vpop.permute.xlu0 %926 }
 0x167   :  { %v596_v31 = vpop.permute.xlu1 %595  ;;  %v376_v14 = vadd.f32 %v1900_v47, %v1868_v56  ;;  %v377_v27 = vadd.f32 %v1901_v22, %v1869_v20  ;;  %vm968_vm2 = vcmp.eq.s32.totalorder %v2918_v41, %v927_v45 }
 0x168   :  { %vm630_vm5 = vcmp.eq.s32.totalorder %v2918_v41, %v596_v31  ;;  %vm631_vm6 = vcmp.eq.s32.totalorder %v2931_v10, %v596_v31  ;;  %v2012_v35 = vsel %vm968_vm2, 1.0, %v2246_v12 }
 0x169   :  { %v1962_v32 = vsel %vm630_vm5, 1.0, %v2246_v12  ;;  %v1963_v26 = vsel %vm631_vm6, 1.0, %v2246_v12  ;;  %2229 = vset.pattern.permute.xlu1 %v4187_v4  ;;  %v1995_v4 = vsel %vm807_vm15, 1.0, %v2246_v12  ;;  %v1064_v38 = vadd.f32 %v2012_v35, %v3667_v39  ;;  %v4227_v35 = vld [vmem:[#allocation18_spill] sm:$0xff] }
 0x16a   :  { %v726_v34 = vadd.f32 %v1962_v32, %v550_v55  ;;  %v727_v36 = vadd.f32 %v1963_v26, %v551_v57  ;;  %1308 = vperm.xlu1 %2229, %v3618_v51   ;;  %v1979_v51 = vsel %vm791_vm4, 1.0, %v2246_v12  ;;  %vm969_vm4 = vcmp.eq.s32.totalorder %v2931_v10, %v927_v45  ;;  %v948_v19 = vpop.permute.xlu0 %947  ;;  %v4226_v45 = vld [vmem:[#allocation17_spill] sm:$0xff] }
 0x16b   :  { %v887_v42 = vadd.f32 %v1979_v51, %v3412_v50  ;;  %v2013_v9 = vsel %vm969_vm4, 1.0, %v2246_v12  ;;  %v1992_v55 = vsel %vm804_vm8, 1.0, %v2246_v12  ;;  %v1993_v57 = vsel %vm805_vm9, 1.0, %v2246_v12 }
 0x16c   :  { %v3812_v59 = vadd.f32 %v1994_v58, %v726_v34  ;;  %v3814_v63 = vadd.f32 %v1995_v4, %v727_v36  ;;  %v3816_v11 = vpop.permute.xlu1 %944  ;;  %v1065_v31 = vadd.f32 %v2013_v9, %v3669_v25  ;;  %v4224_v58 = vld [vmem:[#allocation19_spill] sm:$0xff]  ;;  %v901_v51 = vadd.f32 %v1993_v57, %v4225_v33 }
 0x16d   :  { %v1063_v54 = vadd.f32 %v2011_v52, %v887_v42  ;;  %vm980_vm1 = vcmp.eq.s32.totalorder %v2918_v41, %v3816_v11  ;;  %vm981_vm13 = vcmp.eq.s32.totalorder %v2931_v10, %v3816_v11  ;;  %v900_v4 = vadd.f32 %v1992_v55, %v4224_v58 }
 0x16e   :  { %v2024_v11 = vsel %vm980_vm1, 1.0, %v2246_v12  ;;  %v2025_v40 = vsel %vm981_vm13, 1.0, %v2246_v12  ;;  %vm1148_vm8 = vcmp.eq.s32.totalorder %v2918_v41, %v3387_v30  ;;  %vm1149_vm9 = vcmp.eq.s32.totalorder %v2931_v10, %v3387_v30 }
 0x16f   :  { %v1239_v6 = vadd.f32 %v2043_v23, %v1063_v54  ;;  %v1077_v44 = vadd.f32 %v2025_v40, %v901_v51  ;;  %v2049_v30 = vsel %vm1149_vm9, 1.0, %v2246_v12  ;;  %vm1334_vm1 = vcmp.eq.s32.totalorder %v2918_v41, %v3182_v28 }
 0x170   :  { %vm1335_vm13 = vcmp.eq.s32.totalorder %v2931_v10, %v3182_v28 }
 0x171   :  { %v1276_v16 = vpop.permute.xlu1 %1275 }
 0x172   :  { %vm1318_vm12 = vcmp.eq.s32.totalorder %v2918_v41, %v1276_v16  ;;  %vm1319_vm0 = vcmp.eq.s32.totalorder %v2931_v10, %v1276_v16 }
 0x173   :  { %v2074_v50 = vsel %vm1318_vm12, 1.0, %v2246_v12  ;;  %v2075_v29 = vsel %vm1319_vm0, 1.0, %v2246_v12 }
 0x174   :  { %v1414_v8 = vadd.f32 %v2074_v50, %v1238_v62  ;;  %v1415_v21 = vadd.f32 %v2075_v29, %v1239_v6  ;;  %v1076_v6 = vadd.f32 %v2024_v11, %v900_v4 }
 0x176   :  { %v423_v61 = vpop.permute.xlu1 %422  ;;  %1590 = vmatprep.mubr.f32.mxu0 %v1415_v21  ;;  %v933_v21 = vpop.permute.xlu0 %932 }
 0x177   :  { %vm456_vm14 = vcmp.eq.s32.totalorder %v2918_v41, %v423_v61  ;;  %vm457_vm15 = vcmp.eq.s32.totalorder %v2931_v10, %v423_v61  ;;  %1591 = vmatmul.mubr.f32.gmra.mxu0 %v1414_v8  ;;  %vm972_vm3 = vcmp.eq.s32.totalorder %v2918_v41, %v933_v21  ;;  %vm973_vm7 = vcmp.eq.s32.totalorder %v2931_v10, %v933_v21  ;;  %v4231_v21 = vld [vmem:[#allocation5_spill] sm:$0xff] }
 0x178   :  { %v1932_v5 = vsel %vm456_vm14, 1.0, %v2246_v12  ;;  %v1933_v49 = vsel %vm457_vm15, 1.0, %v2246_v12 }
 0x179   :  { %v3844_v17 = vadd.f32 %v1932_v5, %v376_v14  ;;  %v3846_v2 = vadd.f32 %v1933_v49, %v377_v27 }
 0x17b   :  { %v754_v1 = vpop.permute.xlu1 %753 }
 0x17c   :  { %vm794_vm5 = vcmp.eq.s32.totalorder %v2918_v41, %v754_v1  ;;  %vm795_vm6 = vcmp.eq.s32.totalorder %v2931_v10, %v754_v1  ;;  %v2016_v1 = vsel %vm972_vm3, 1.0, %v2246_v12 }
 0x17d   :  { %v1982_v15 = vsel %vm794_vm5, 1.0, %v2246_v12  ;;  %v1983_v43 = vsel %vm795_vm6, 1.0, %v2246_v12 }
 0x17e   :  { %v890_v32 = vadd.f32 %v1982_v15, %v3770_v46  ;;  %v891_v26 = vadd.f32 %v1983_v43, %v3772_v53  ;;  %v2048_v15 = vsel %vm1148_vm8, 1.0, %v2246_v12 }
 0x180   :  { %v1103_v18 = vpop.permute.xlu1 %1102 }
 0x181   :  { %vm1144_vm10 = vcmp.eq.s32.totalorder %v2918_v41, %v1103_v18  ;;  %vm1145_vm11 = vcmp.eq.s32.totalorder %v2931_v10, %v1103_v18  ;;  %v2017_v18 = vsel %vm973_vm7, 1.0, %v2246_v12 }
 0x182   :  { %v2044_v34 = vsel %vm1144_vm10, 1.0, %v2246_v12  ;;  %v2045_v46 = vsel %vm1145_vm11, 1.0, %v2246_v12 }
 0x183   :  { %v1240_v23 = vadd.f32 %v2044_v34, %v1064_v38  ;;  %v1241_v60 = vadd.f32 %v2045_v46, %v1065_v31 }
 0x184   :  { %v1121_v37 = vpop.permute.xlu1 %1120 }
 0x185   :  { %vm1156_vm14 = vcmp.eq.s32.totalorder %v2918_v41, %v1121_v37  ;;  %vm1157_vm15 = vcmp.eq.s32.totalorder %v2931_v10, %v1121_v37 }
 0x186   :  { %v2056_v54 = vsel %vm1156_vm14, 1.0, %v2246_v12  ;;  %v2057_v7 = vsel %vm1157_vm15, 1.0, %v2246_v12 }
 0x187   :  { %v1252_v22 = vadd.f32 %v2056_v54, %v1076_v6  ;;  %v1253_v8 = vadd.f32 %v2057_v7, %v1077_v44  ;;  %v4230_v54 = vld [vmem:[#allocation23_spill] sm:$0xff] }
 0x188   :  { %vm458_vm8 = vcmp.eq.s32.totalorder %v2918_v41, %v4230_v54  ;;  %vm459_vm9 = vcmp.eq.s32.totalorder %v2931_v10, %v4230_v54 }
 0x189   :  { %v3852_v24 = vpop.permute.xlu1 %598  ;;  %v1934_v6 = vsel %vm458_vm8, 1.0, %v2246_v12  ;;  %v1935_v44 = vsel %vm459_vm9, 1.0, %v2246_v12 }
 0x18e   :  { %v930_v3 = vpop.permute.xlu1 %929 }
 0x18f   :  { %vm970_vm12 = vcmp.eq.s32.totalorder %v2918_v41, %v930_v3  ;;  %vm971_vm0 = vcmp.eq.s32.totalorder %v2931_v10, %v930_v3 }
 0x190   :  { %v2014_v39 = vsel %vm970_vm12, 1.0, %v2246_v12  ;;  %v2015_v25 = vsel %vm971_vm0, 1.0, %v2246_v12  ;;  %vm982_vm12 = vcmp.eq.s32.totalorder %v2918_v41, %v948_v19  ;;  %vm983_vm0 = vcmp.eq.s32.totalorder %v2931_v10, %v948_v19 }
 0x191   :  { %v1066_v36 = vadd.f32 %v2014_v39, %v890_v32  ;;  %v1067_v53 = vadd.f32 %v2015_v25, %v891_v26  ;;  %v2026_v38 = vsel %vm982_vm12, 1.0, %v2246_v12  ;;  %v2027_v31 = vsel %vm983_vm0, 1.0, %v2246_v12 }
 0x192   :  { %v1078_v32 = vadd.f32 %v2026_v38, %v3812_v59  ;;  %v1079_v26 = vadd.f32 %v2027_v31, %v3814_v63 }
 0x193   :  { %v1279_v52 = vpop.permute.xlu1 %1278  ;;  %v3892_v13 = vadd.f32 %v2046_v0, %v1066_v36  ;;  %v3894_v42 = vadd.f32 %v2047_v48, %v1067_v53  ;;  %v2090_v36 = vsel %vm1334_vm1, 1.0, %v2246_v12  ;;  %v2091_v53 = vsel %vm1335_vm13, 1.0, %v2246_v12 }
 0x194   :  { %vm1320_vm2 = vcmp.eq.s32.totalorder %v2918_v41, %v1279_v52  ;;  %vm1321_vm4 = vcmp.eq.s32.totalorder %v2931_v10, %v1279_v52 }
 0x195   :  { %v2076_v16 = vsel %vm1320_vm2, 1.0, %v2246_v12  ;;  %v2077_v62 = vsel %vm1321_vm4, 1.0, %v2246_v12 }
 0x196   :  { %v1416_v50 = vadd.f32 %v2076_v16, %v1240_v23  ;;  %v1417_v29 = vadd.f32 %v2077_v62, %v1241_v60  ;;  %v4228_v23 = vld [vmem:[#allocation6_spill] sm:$0xff]  ;;  %v4229_v60 = vld [vmem:[#allocation11_spill] sm:$0xff] }
 0x197   :  { %v1297_v47 = vpop.permute.xlu1 %1296  ;;  %vm282_vm3 = vcmp.eq.s32.totalorder %v2918_v41, %v4229_v60  ;;  %vm283_vm7 = vcmp.eq.s32.totalorder %v2931_v10, %v4229_v60 }
 0x198   :  { %vm1332_vm5 = vcmp.eq.s32.totalorder %v2918_v41, %v1297_v47  ;;  %vm1333_vm6 = vcmp.eq.s32.totalorder %v2931_v10, %v1297_v47  ;;  %1596 = vmatprep.mubr.f32.mxu0 %v1417_v29  ;;  %v1902_v16 = vsel %vm282_vm3, 1.0, %v2246_v12  ;;  %v1903_v62 = vsel %vm283_vm7, 1.0, %v2246_v12 }
 0x199   :  { %v2088_v56 = vsel %vm1332_vm5, 1.0, %v2246_v12  ;;  %v2089_v20 = vsel %vm1333_vm6, 1.0, %v2246_v12  ;;  %1597 = vmatmul.mubr.f32.gmra.mxu0 %v1416_v50  ;;  %vm106_vm5 = vcmp.eq.s32.totalorder %v2918_v41, %v4228_v23  ;;  %vm107_vm6 = vcmp.eq.s32.totalorder %v2931_v10, %v4228_v23  ;;  %v3982_v50 = vpop.permute.xlu0 %953 }
 0x19a   :  { %v1428_v61 = vadd.f32 %v2088_v56, %v1252_v22  ;;  %v1429_v14 = vadd.f32 %v2089_v20, %v1253_v8  ;;  %vm986_vm3 = vcmp.eq.s32.totalorder %v2918_v41, %v3982_v50  ;;  %vm987_vm7 = vcmp.eq.s32.totalorder %v2931_v10, %v3982_v50 }
 0x19c   :  { %v757_v27 = vpop.permute.xlu1 %756  ;;  %1632 = vmatprep.mubr.f32.mxu1 %v1429_v14 }
 0x19d   :  { %vm796_vm10 = vcmp.eq.s32.totalorder %v2918_v41, %v757_v27  ;;  %vm797_vm11 = vcmp.eq.s32.totalorder %v2931_v10, %v757_v27  ;;  %1633 = vmatmul.mubr.f32.gmra.mxu1 %v1428_v61  ;;  %v4232_v27 = vld [vmem:[#allocation12_spill] sm:$0xff] }
 0x19e   :  { %v1984_v5 = vsel %vm796_vm10, 1.0, %v2246_v12  ;;  %v1985_v49 = vsel %vm797_vm11, 1.0, %v2246_v12  ;;  %vm632_vm10 = vcmp.eq.s32.totalorder %v2918_v41, %v3852_v24  ;;  %vm633_vm11 = vcmp.eq.s32.totalorder %v2931_v10, %v3852_v24 }
 0x19f   :  { %v892_v37 = vadd.f32 %v1984_v5, %v4226_v45  ;;  %v893_v9 = vadd.f32 %v1985_v49, %v4227_v35  ;;  %v1964_v22 = vsel %vm632_vm10, 1.0, %v2246_v12  ;;  %v1965_v8 = vsel %vm633_vm11, 1.0, %v2246_v12 }
 0x1a0   :  { %v3924_v43 = vpop.permute.xlu1 %774  ;;  %v728_v5 = vadd.f32 %v1964_v22, %v3844_v17  ;;  %v729_v49 = vadd.f32 %v1965_v8, %v3846_v2 }
 0x1a1   :  { %v1068_v0 = vadd.f32 %v2016_v1, %v892_v37  ;;  %v1069_v48 = vadd.f32 %v2017_v18, %v893_v9  ;;  %vm808_vm12 = vcmp.eq.s32.totalorder %v2918_v41, %v3924_v43  ;;  %vm809_vm0 = vcmp.eq.s32.totalorder %v2931_v10, %v3924_v43  ;;  %v4006_v1 = vpop.permute.xlu0 %780 }
 0x1a2   :  { %v1996_v61 = vsel %vm808_vm12, 1.0, %v2246_v12  ;;  %v1997_v14 = vsel %vm809_vm0, 1.0, %v2246_v12 }
 0x1a3   :  { %v3928_v55 = vadd.f32 %v2048_v15, %v1068_v0  ;;  %v3930_v57 = vadd.f32 %v2049_v30, %v1069_v48  ;;  %v904_v17 = vadd.f32 %v1996_v61, %v728_v5  ;;  %v905_v2 = vadd.f32 %v1997_v14, %v729_v49 }
 0x1a5   :  { %v1124_v3 = vpop.permute.xlu1 %1123  ;;  %v1306_v43 = vpop.permute.xlu0 %1305 }
 0x1a6   :  { %vm1158_vm14 = vcmp.eq.s32.totalorder %v2918_v41, %v1124_v3  ;;  %vm1159_vm15 = vcmp.eq.s32.totalorder %v2931_v10, %v1124_v3 }
 0x1a7   :  { %v2058_v39 = vsel %vm1158_vm14, 1.0, %v2246_v12  ;;  %v2059_v25 = vsel %vm1159_vm15, 1.0, %v2246_v12  ;;  %vm108_vm14 = vcmp.eq.s32.totalorder %v2918_v41, %v4231_v21  ;;  %vm109_vm15 = vcmp.eq.s32.totalorder %v2931_v10, %v4231_v21 }
 0x1a8   :  { %v1254_v34 = vadd.f32 %v2058_v39, %v1078_v32  ;;  %v1255_v46 = vadd.f32 %v2059_v25, %v1079_v26 }
 0x1aa   :  { %v3944_v28 = vpop.permute.xlu1 %601  ;;  %v1431_v58 = vadd.f32 %v2091_v53, %v1255_v46  ;;  %v1430_v59 = vadd.f32 %v2090_v36, %v1254_v34 }
 0x1ac   :  { %1638 = vmatprep.mubr.f32.mxu1 %v1431_v58 }
 0x1ad   :  { %1639 = vmatmul.mubr.f32.gmra.mxu1 %v1430_v59  ;;  %v1872_v59 = vsel %vm108_vm14, 1.0, %v2246_v12 }
 0x1af   :  { %v951_v63 = vpop.permute.xlu1 %950 }
 0x1b0   :  { %vm984_vm1 = vcmp.eq.s32.totalorder %v2918_v41, %v951_v63  ;;  %vm985_vm13 = vcmp.eq.s32.totalorder %v2931_v10, %v951_v63  ;;  %v1873_v63 = vsel %vm109_vm15, 1.0, %v2246_v12 }
 0x1b1   :  { %v2028_v18 = vsel %vm984_vm1, 1.0, %v2246_v12  ;;  %v2029_v45 = vsel %vm985_vm13, 1.0, %v2246_v12  ;;  %vm1338_vm1 = vcmp.eq.s32.totalorder %v2918_v41, %v1306_v43  ;;  %vm1339_vm13 = vcmp.eq.s32.totalorder %v2931_v10, %v1306_v43 }
 0x1b2   :  { %v1080_v15 = vadd.f32 %v2028_v18, %v904_v17  ;;  %v1081_v30 = vadd.f32 %v2029_v45, %v905_v2  ;;  %v2094_v60 = vsel %vm1338_vm1, 1.0, %v2246_v12 }
 0x1b4   :  { %v1282_v4 = vpop.permute.xlu1 %1281 }
 0x1b5   :  { %vm1322_vm2 = vcmp.eq.s32.totalorder %v2918_v41, %v1282_v4  ;;  %vm1323_vm4 = vcmp.eq.s32.totalorder %v2931_v10, %v1282_v4 }
 0x1b6   :  { %v2078_v33 = vsel %vm1322_vm2, 1.0, %v2246_v12  ;;  %v2079_v51 = vsel %vm1323_vm4, 1.0, %v2246_v12  ;;  %vm284_vm2 = vcmp.eq.s32.totalorder %v2918_v41, %v4232_v27  ;;  %vm285_vm4 = vcmp.eq.s32.totalorder %v2931_v10, %v4232_v27 }
 0x1b7   :  { %v1418_v11 = vadd.f32 %v2078_v33, %v3892_v13  ;;  %v1419_v40 = vadd.f32 %v2079_v51, %v3894_v42  ;;  %v1870_v13 = vsel %vm106_vm5, 1.0, %v2246_v12  ;;  %v1871_v42 = vsel %vm107_vm6, 1.0, %v2246_v12 }
 0x1b8   :  { %v378_v29 = vadd.f32 %v1902_v16, %v1870_v13  ;;  %v379_v47 = vadd.f32 %v1903_v62, %v1871_v42  ;;  %vm634_vm5 = vcmp.eq.s32.totalorder %v2918_v41, %v3944_v28  ;;  %vm635_vm6 = vcmp.eq.s32.totalorder %v2931_v10, %v3944_v28 }
 0x1b9   :  { %v3952_v52 = vpop.permute.xlu1 %428  ;;  %1602 = vmatprep.mubr.f32.mxu0 %v1419_v40  ;;  %v1966_v37 = vsel %vm634_vm5, 1.0, %v2246_v12  ;;  %v1967_v35 = vsel %vm635_vm6, 1.0, %v2246_v12  ;;  %v1904_v51 = vsel %vm284_vm2, 1.0, %v2246_v12  ;;  %v2030_v40 = vsel %vm986_vm3, 1.0, %v2246_v12 }
 0x1ba   :  { %1603 = vmatmul.mubr.f32.gmra.mxu0 %v1418_v11  ;;  %v554_v56 = vadd.f32 %v1934_v6, %v378_v29  ;;  %v555_v20 = vadd.f32 %v1935_v44, %v379_v47  ;;  %v1905_v11 = vsel %vm285_vm4, 1.0, %v2246_v12  ;;  %vm460_vm14 = vcmp.eq.s32.totalorder %v2918_v41, %v3952_v52 }
 0x1bb   :  { %vm461_vm15 = vcmp.eq.s32.totalorder %v2931_v10, %v3952_v52  ;;  %v2095_v13 = vsel %vm1339_vm13, 1.0, %v2246_v12  ;;  %v1936_v16 = vsel %vm460_vm14, 1.0, %v2246_v12  ;;  %v380_v50 = vadd.f32 %v1904_v51, %v1872_v59 }
 0x1bc   :  { %v730_v25 = vadd.f32 %v1966_v37, %v554_v56  ;;  %v731_v34 = vadd.f32 %v1967_v35, %v555_v20  ;;  %v1937_v62 = vsel %vm461_vm15, 1.0, %v2246_v12  ;;  %v381_v29 = vadd.f32 %v1905_v11, %v1873_v63 }
 0x1bd   :  { %vm1750_vm14 = vcmask 261312   ;;  %vm1757_vm15 = vcmask 326912  }
 0x1be   :  { %v3954_v19 = vpop.permute.xlu1 %777  ;;  %v557_v20 = vadd.f32 %v1937_v62, %v381_v29 }
 0x1bf   :  { %vm810_vm10 = vcmp.eq.s32.totalorder %v2918_v41, %v3954_v19  ;;  %vm811_vm11 = vcmp.eq.s32.totalorder %v2931_v10, %v3954_v19  ;;  %v2031_v19 = vsel %vm987_vm7, 1.0, %v2246_v12 }
 0x1c0   :  { %v1998_v3 = vsel %vm810_vm10, 1.0, %v2246_v12  ;;  %v1999_v32 = vsel %vm811_vm11, 1.0, %v2246_v12 }
 0x1c1   :  { %v906_v28 = vadd.f32 %v1998_v3, %v730_v25  ;;  %v907_v58 = vadd.f32 %v1999_v32, %v731_v34 }
 0x1c3   :  { %v1127_v7 = vpop.permute.xlu1 %1126  ;;  %v1082_v42 = vadd.f32 %v2030_v40, %v906_v28  ;;  %v1083_v54 = vadd.f32 %v2031_v19, %v907_v58 }
 0x1c4   :  { %vm1160_vm8 = vcmp.eq.s32.totalorder %v2918_v41, %v1127_v7  ;;  %vm1161_vm9 = vcmp.eq.s32.totalorder %v2931_v10, %v1127_v7 }
 0x1c5   :  { %v2060_v0 = vsel %vm1160_vm8, 1.0, %v2246_v12  ;;  %v2061_v48 = vsel %vm1161_vm9, 1.0, %v2246_v12  ;;  %vm812_vm8 = vcmp.eq.s32.totalorder %v2918_v41, %v4006_v1  ;;  %vm813_vm9 = vcmp.eq.s32.totalorder %v2931_v10, %v4006_v1 }
 0x1c6   :  { %v1256_v36 = vadd.f32 %v2060_v0, %v1080_v15  ;;  %v1257_v53 = vadd.f32 %v2061_v48, %v1081_v30  ;;  %v2000_v27 = vsel %vm812_vm8, 1.0, %v2246_v12  ;;  %v2001_v5 = vsel %vm813_vm9, 1.0, %v2246_v12 }
 0x1c7   :  { %vm1792_vm8 = vcmask 654912   ;;  %vm1799_vm9 = vcmask 720512  }
 0x1c8   :  { %v3988_v24 = vpop.permute.xlu1 %604 }
 0x1c9   :  { %vm636_vm3 = vcmp.eq.s32.totalorder %v2918_v41, %v3988_v24  ;;  %vm637_vm7 = vcmp.eq.s32.totalorder %v2931_v10, %v3988_v24  ;;  %v556_v24 = vadd.f32 %v1936_v16, %v380_v50 }
 0x1ca   :  { %v1968_v47 = vsel %vm636_vm3, 1.0, %v2246_v12  ;;  %v1969_v22 = vsel %vm637_vm7, 1.0, %v2246_v12  ;;  %vm1778_vm3 = vcmask 523712   ;;  %vm1785_vm7 = vcmask 589312  }
 0x1cb   :  { %v732_v61 = vadd.f32 %v1968_v47, %v556_v24  ;;  %v733_v14 = vadd.f32 %v1969_v22, %v557_v20 }
 0x1cd   :  { %v1285_v9 = vpop.permute.xlu1 %1284  ;;  %v908_v1 = vadd.f32 %v2000_v27, %v732_v61  ;;  %v909_v17 = vadd.f32 %v2001_v5, %v733_v14 }
 0x1ce   :  { %vm1324_vm12 = vcmp.eq.s32.totalorder %v2918_v41, %v1285_v9  ;;  %vm1325_vm0 = vcmp.eq.s32.totalorder %v2931_v10, %v1285_v9 }
 0x1cf   :  { %v2080_v38 = vsel %vm1324_vm12, 1.0, %v2246_v12  ;;  %v2081_v31 = vsel %vm1325_vm0, 1.0, %v2246_v12 }
 0x1d0   :  { %v1420_v26 = vadd.f32 %v2080_v38, %v3928_v55  ;;  %v1421_v39 = vadd.f32 %v2081_v31, %v3930_v57 }
 0x1d1   :  { %v1303_v46 = vpop.permute.xlu1 %1302 }
 0x1d2   :  { %vm1336_vm5 = vcmp.eq.s32.totalorder %v2918_v41, %v1303_v46  ;;  %vm1337_vm6 = vcmp.eq.s32.totalorder %v2931_v10, %v1303_v46  ;;  %1608 = vmatprep.mubr.f32.mxu0 %v1421_v39 }
 0x1d3   :  { %v2092_v55 = vsel %vm1336_vm5, 1.0, %v2246_v12  ;;  %v2093_v57 = vsel %vm1337_vm6, 1.0, %v2246_v12  ;;  %1609 = vmatmul.mubr.f32.gmra.mxu0 %v1420_v26  ;;  %vm1736_vm5 = vcmask 130112   ;;  %vm1743_vm6 = vcmask 195712  }
 0x1d4   :  { %v1432_v4 = vadd.f32 %v2092_v55, %v1256_v36  ;;  %v1433_v33 = vadd.f32 %v2093_v57, %v1257_v53 }
 0x1d6   :  { %v1130_v23 = vpop.permute.xlu1 %1129  ;;  %1644 = vmatprep.mubr.f32.mxu1 %v1433_v33 }
 0x1d7   :  { %vm1162_vm2 = vcmp.eq.s32.totalorder %v2918_v41, %v1130_v23  ;;  %vm1163_vm4 = vcmp.eq.s32.totalorder %v2931_v10, %v1130_v23  ;;  %1645 = vmatmul.mubr.f32.gmra.mxu1 %v1432_v4  ;;  %v1616_v39 = vpop.f32.mrf.mxu1 }
 0x1d8   :  { %v2062_v52 = vsel %vm1162_vm2, 1.0, %v2246_v12  ;;  %v2063_v7 = vsel %vm1163_vm4, 1.0, %v2246_v12  ;;  %vm1764_vm2 = vcmask 392512   ;;  %vm1771_vm4 = vcmask 458112  }
 0x1d9   :  { %v1258_v6 = vadd.f32 %v2062_v52, %v1082_v42  ;;  %v1259_v44 = vadd.f32 %v2063_v7, %v1083_v54  ;;  %v1618_v36 = vpop.f32.mrf.mxu1 }
 0x1da   :  { %v1671_v28 = vmul.f32 %v1618_v36, %v1616_v39 }
 0x1db   :  { %v1434_v8 = vadd.f32 %v2094_v60, %v1258_v6  ;;  %v1435_v21 = vadd.f32 %v2095_v13, %v1259_v44  ;;  %v957_v56 = vpop.permute.xlu1 %956 }
 0x1dc   :  { %vm988_vm10 = vcmp.eq.s32.totalorder %v2918_v41, %v957_v56  ;;  %vm989_vm11 = vcmp.eq.s32.totalorder %v2931_v10, %v957_v56 }
 0x1dd   :  { %1650 = vmatprep.mubr.f32.mxu1 %v1435_v21  ;;  %v2032_v18 = vsel %vm988_vm10, 1.0, %v2246_v12  ;;  %v2033_v45 = vsel %vm989_vm11, 1.0, %v2246_v12  ;;  %vm1806_vm10 = vcmask 786112   ;;  %vm1813_vm11 = vcmask 851712  }
 0x1de   :  { %1651 = vmatmul.mubr.f32.gmra.mxu1 %v1434_v8  ;;  %v1084_v35 = vadd.f32 %v2032_v18, %v908_v1  ;;  %v1085_v9 = vadd.f32 %v2033_v45, %v909_v17 }
 0x1e0   :  { %v1133_v49 = vpop.permute.xlu1 %1132 }
 0x1e1   :  { %vm1164_vm12 = vcmp.eq.s32.totalorder %v2918_v41, %v1133_v49  ;;  %vm1165_vm0 = vcmp.eq.s32.totalorder %v2931_v10, %v1133_v49 }
 0x1e2   :  { %v2064_v2 = vsel %vm1164_vm12, 1.0, %v2246_v12  ;;  %v2065_v37 = vsel %vm1165_vm0, 1.0, %v2246_v12  ;;  %vm1820_vm12 = vcmask 917312   ;;  %vm1827_vm0 = vcmask 982912  }
 0x1e3   :  { %v1260_v30 = vadd.f32 %v2064_v2, %v1084_v35  ;;  %v1261_v43 = vadd.f32 %v2065_v37, %v1085_v9  ;;  %v1731_v35 = vadd.s32 4294967288, %v2918_v41 }
 0x1e5   :  { %v1309_v15 = vpop.permute.xlu1 %1308 }
 0x1e6   :  { %vm1340_vm1 = vcmp.eq.s32.totalorder %v2918_v41, %v1309_v15  ;;  %vm1341_vm13 = vcmp.eq.s32.totalorder %v2931_v10, %v1309_v15  ;;  %v1738_v15 = vadd.s32 4294967280, %v2918_v41 }
 0x1e7   :  { %v2096_v0 = vsel %vm1340_vm1, 1.0, %v2246_v12  ;;  %v2097_v48 = vsel %vm1341_vm13, 1.0, %v2246_v12  ;;  %vm1834_vm1 = vcmask 1048512  }
 0x1e8   :  { %v1436_v38 = vadd.f32 %v2096_v0, %v1260_v30  ;;  %v1437_v31 = vadd.f32 %v2097_v48, %v1261_v43  ;;  %v4233_v43 = vlaneseq  ;;  %v1745_v48 = vadd.s32 4294967272, %v2918_v41 }
 0x1ea   :  { %1656 = vmatprep.mubr.f32.mxu1 %v1437_v31  ;;  %v4109_v0 = vshrl.u32 %v4233_v43, 7 }
 0x1eb   :  { %1657 = vmatmul.mubr.f32.gmra.mxu1 %v1436_v38  ;;  %v1752_v38 = vadd.s32 4294967264, %v2918_v41 }
 0x1ec   :  { %v1734_v31 = vsub.s32 %v1731_v35, %v4109_v0  ;;  %v1729_v39 = vsub.s32 %v2918_v41, %v4109_v0 }
 0x1ed   :  { %v1755_v36 = vsub.s32 %v1752_v38, %v4109_v0 }
 0x1ee   :  { %v1568_v3 = vpop.f32.mrf.mxu0 }
 0x1f0   :  { %v1570_v32 = vpop.f32.mrf.mxu0 }
 0x1f1   :  { %v1663_v26 = vmul.f32 %v1570_v32, %v1568_v3  ;;  %v1759_v3 = vadd.s32 4294967256, %v2918_v41  ;;  %v1741_v32 = vsub.s32 %v1738_v15, %v4109_v0 }
 0x1f2   :  { %v1574_v25 = vpop.f32.mrf.mxu0 }
 0x1f3   :  { %1679 = vadd.xlane.f32.xlu0 %v1663_v26  ;;  %v1766_v26 = vadd.s32 4294967248, %v2918_v41 }
 0x1f4   :  { %v1576_v34 = vpop.f32.mrf.mxu0 }
 0x1f5   :  { %v1664_v46 = vmul.f32 %v1576_v34, %v1574_v25  ;;  %v1748_v25 = vsub.s32 %v1745_v48, %v4109_v0 }
 0x1f6   :  { %v1580_v53 = vpop.f32.mrf.mxu0 }
 0x1f7   :  { %1681 = vadd.xlane.f32.xlu1 %v1664_v46  ;;  %v1773_v46 = vadd.s32 4294967240, %v2918_v41 }
 0x1f8   :  { %v1582_v10 = vpop.f32.mrf.mxu0 }
 0x1f9   :  { %v1665_v58 = vmul.f32 %v1582_v10, %v1580_v53 }
 0x1fa   :  { %v1586_v55 = vpop.f32.mrf.mxu0 }
 0x1fb   :  { %1695 = vadd.xlane.f32.xlu1 %v1671_v28  ;;  %1683 = vadd.xlane.f32.xlu0 %v1665_v58  ;;  %v1762_v28 = vsub.s32 %v1759_v3, %v4109_v0 }
 0x1fc   :  { %v1588_v12 = vpop.f32.mrf.mxu0 }
 0x1fd   :  { %v1666_v57 = vmul.f32 %v1588_v12, %v1586_v55  ;;  %v1769_v55 = vsub.s32 %v1766_v26, %v4109_v0 }
 0x1ff   :  { %1685 = vadd.xlane.f32.xlu0 %v1666_v57 }
 0x215   :  { %v1622_v59 = vpop.f32.mrf.mxu1 }
 0x217   :  { %v1624_v63 = vpop.f32.mrf.mxu1 }
 0x218   :  { %v1672_v4 = vmul.f32 %v1624_v63, %v1622_v59  ;;  %v1776_v63 = vsub.s32 %v1773_v46, %v4109_v0 }
 0x219   :  { %v1628_v33 = vpop.f32.mrf.mxu1 }
 0x21a   :  { %1697 = vadd.xlane.f32.xlu0 %v1672_v4  ;;  %v1780_v4 = vadd.s32 4294967232, %v2918_v41 }
 0x21b   :  { %v1630_v19 = vpop.f32.mrf.mxu1 }
 0x21c   :  { %v1673_v23 = vmul.f32 %v1630_v19, %v1628_v33 }
 0x237   :  { %v1592_v51 = vpop.f32.mrf.mxu0 }
 0x239   :  { %v1594_v11 = vpop.f32.mrf.mxu0 }
 0x23a   :  { %v1667_v40 = vmul.f32 %v1594_v11, %v1592_v51 }
 0x23c   :  { %1687 = vadd.xlane.f32.xlu1 %v1667_v40 }
 0x240   :  { %1699 = vadd.xlane.f32.xlu1 %v1673_v23 }
 0x259   :  { %v1598_v60 = vpop.f32.mrf.mxu0 }
 0x25b   :  { %v1600_v13 = vpop.f32.mrf.mxu0 }
 0x25c   :  { %v1668_v42 = vmul.f32 %v1600_v13, %v1598_v60  ;;  %v1787_v13 = vadd.s32 4294967224, %v2918_v41 }
 0x25d   :  { %v1634_v54 = vpop.f32.mrf.mxu1 }
 0x25e   :  { %1689 = vadd.xlane.f32.xlu0 %v1668_v42 }
 0x25f   :  { %v1636_v52 = vpop.f32.mrf.mxu1 }
 0x260   :  { %v1674_v7 = vmul.f32 %v1636_v52, %v1634_v54  ;;  %v1783_v54 = vsub.s32 %v1780_v4, %v4109_v0 }
 0x262   :  { %1701 = vadd.xlane.f32.xlu0 %v1674_v7 }
 0x26d   :  { %v1640_v16 = vpop.f32.mrf.mxu1 }
 0x26f   :  { %v1642_v50 = vpop.f32.mrf.mxu1 }
 0x270   :  { %v1675_v29 = vmul.f32 %v1642_v50, %v1640_v16  ;;  %v1794_v16 = vadd.s32 4294967216, %v2918_v41 }
 0x27a   :  { %v1604_v62 = vpop.f32.mrf.mxu0 }
 0x27c   :  { %v1606_v6 = vpop.f32.mrf.mxu0  ;;  %v1680_v18 = vpop.xlane.xlu0 %1679 }
 0x27d   :  { %v1669_v44 = vmul.f32 %v1606_v6, %v1604_v62  ;;  %v1730_v12 = vrot.slane %v1680_v18, %v1729_v39  ;;  %v1790_v6 = vsub.s32 %v1787_v13, %v4109_v0 }
 0x27f   :  { %1691 = vadd.xlane.f32.xlu1 %v1669_v44 }
 0x280   :  { %v1682_v1 = vpop.xlane.xlu1 %1681 }
 0x281   :  { %v1735_v10 = vrot.slane %v1682_v1, %v1734_v31 }
 0x283   :  { %1703 = vadd.xlane.f32.xlu1 %v1675_v29  ;;  %v1737_v11 = vsel %vm1736_vm5, %v1735_v10, %v1730_v12  ;;  %v1801_v29 = vadd.s32 4294967208, %v2918_v41 }
 0x284   :  { %v1684_v45 = vpop.xlane.xlu0 %1683  ;;  %v1696_v2 = vpop.xlane.xlu1 %1695 }
 0x285   :  { %v1742_v58 = vrot.slane %v1684_v45, %v1741_v32  ;;  %v1784_v50 = vrot.slane %v1696_v2, %v1783_v54  ;;  %v1829_v45 = vadd.s32 4294967176, %v2918_v41 }
 0x287   :  { %v1744_v19 = vsel %vm1743_vm6, %v1742_v58, %v1737_v11  ;;  %v1832_v15 = vsub.s32 %v1829_v45, %v4109_v0 }
 0x288   :  { %v1686_v17 = vpop.xlane.xlu0 %1685 }
 0x289   :  { %v1749_v57 = vrot.slane %v1686_v17, %v1748_v25 }
 0x28b   :  { %v1751_v60 = vsel %vm1750_vm14, %v1749_v57, %v1744_v19 }
 0x293   :  { %v1610_v47 = vpop.f32.mrf.mxu0 }
 0x295   :  { %v1612_v22 = vpop.f32.mrf.mxu0 }
 0x296   :  { %v1670_v8 = vmul.f32 %v1612_v22, %v1610_v47  ;;  %v1797_v47 = vsub.s32 %v1794_v16, %v4109_v0 }
 0x297   :  { %v1646_v21 = vpop.f32.mrf.mxu1 }
 0x298   :  { %1693 = vadd.xlane.f32.xlu0 %v1670_v8 }
 0x299   :  { %v1648_v56 = vpop.f32.mrf.mxu1 }
 0x29a   :  { %v1676_v24 = vmul.f32 %v1648_v56, %v1646_v21  ;;  %v1808_v21 = vadd.s32 4294967200, %v2918_v41  ;;  %v1804_v56 = vsub.s32 %v1801_v29, %v4109_v0 }
 0x29c   :  { %1705 = vadd.xlane.f32.xlu0 %v1676_v24 }
 0x29e   :  { %v1652_v20 = vpop.f32.mrf.mxu1 }
 0x2a0   :  { %v1654_v61 = vpop.f32.mrf.mxu1 }
 0x2a1   :  { %v1677_v14 = vmul.f32 %v1654_v61, %v1652_v20  ;;  %v1822_v61 = vadd.s32 4294967184, %v2918_v41 }
 0x2a3   :  { %1707 = vadd.xlane.f32.xlu1 %v1677_v14  ;;  %v1698_v37 = vpop.xlane.xlu0 %1697  ;;  %v1825_v1 = vsub.s32 %v1822_v61, %v4109_v0 }
 0x2a4   :  { %v1791_v8 = vrot.slane %v1698_v37, %v1790_v6 }
 0x2ab   :  { %v1658_v27 = vpop.f32.mrf.mxu1 }
 0x2ad   :  { %v1660_v5 = vpop.f32.mrf.mxu1 }
 0x2ae   :  { %v1678_v49 = vmul.f32 %v1660_v5, %v1658_v27  ;;  %v1815_v27 = vadd.s32 4294967192, %v2918_v41  ;;  %v1811_v5 = vsub.s32 %v1808_v21, %v4109_v0 }
 0x2b0   :  { %1709 = vadd.xlane.f32.xlu0 %v1678_v49  ;;  %v1818_v2 = vsub.s32 %v1815_v27, %v4109_v0 }
 0x2c5   :  { %v1688_v9 = vpop.xlane.xlu1 %1687 }
 0x2c6   :  { %v1756_v33 = vrot.slane %v1688_v9, %v1755_v36 }
 0x2c8   :  { %v1758_v52 = vsel %vm1757_vm15, %v1756_v33, %v1751_v60 }
 0x2c9   :  { %v1700_v34 = vpop.xlane.xlu1 %1699 }
 0x2ca   :  { %v1798_v20 = vrot.slane %v1700_v34, %v1797_v47 }
 0x2e7   :  { %v1690_v30 = vpop.xlane.xlu0 %1689 }
 0x2e8   :  { %v1763_v40 = vrot.slane %v1690_v30, %v1762_v28 }
 0x2ea   :  { %v1765_v7 = vsel %vm1764_vm2, %v1763_v40, %v1758_v52 }
 0x2eb   :  { %v1702_v53 = vpop.xlane.xlu0 %1701 }
 0x2ec   :  { %v1805_v18 = vrot.slane %v1702_v53, %v1804_v56 }
 0x308   :  { %v1692_v59 = vpop.xlane.xlu1 %1691 }
 0x309   :  { %v1770_v23 = vrot.slane %v1692_v59, %v1769_v55 }
 0x30b   :  { %v1772_v62 = vsel %vm1771_vm4, %v1770_v23, %v1765_v7 }
 0x30c   :  { %v1704_v14 = vpop.xlane.xlu1 %1703 }
 0x30d   :  { %v1812_v35 = vrot.slane %v1704_v14, %v1811_v5 }
 0x321   :  { %v1694_v51 = vpop.xlane.xlu0 %1693 }
 0x322   :  { %v1777_v42 = vrot.slane %v1694_v51, %v1776_v63 }
 0x324   :  { %v1779_v44 = vsel %vm1778_vm3, %v1777_v42, %v1772_v62 }
 0x325   :  { %v1786_v22 = vsel %vm1785_vm7, %v1784_v50, %v1779_v44  ;;  %v1706_v9 = vpop.xlane.xlu0 %1705 }
 0x326   :  { %v1793_v24 = vsel %vm1792_vm8, %v1791_v8, %v1786_v22  ;;  %v1819_v48 = vrot.slane %v1706_v9, %v1818_v2 }
 0x327   :  { %v1800_v49 = vsel %vm1799_vm9, %v1798_v20, %v1793_v24 }
 0x328   :  { %v1807_v17 = vsel %vm1806_vm10, %v1805_v18, %v1800_v49 }
 0x329   :  { %v1814_v30 = vsel %vm1813_vm11, %v1812_v35, %v1807_v17 }
 0x32a   :  { %v1821_v31 = vsel %vm1820_vm12, %v1819_v48, %v1814_v30 }
 0x32c   :  { %v1708_v37 = vpop.xlane.xlu1 %1707 }
 0x32d   :  { %v1826_v43 = vrot.slane %v1708_v37, %v1825_v1 }
 0x32f   :  { %v1828_v3 = vsel %vm1827_vm0, %v1826_v43, %v1821_v31 }
 0x339   :  { %v1710_v38 = vpop.xlane.xlu0 %1709 }
 0x33a   :  { %v1833_v41 = vrot.slane %v1710_v38, %v1832_v15 }
 0x33c   :  { %v1835_v32 = vsel %vm1834_vm1, %v1833_v41, %v1828_v3 }
 0x33d   :  { %1837 = vst [vmem:[%s4146_s2] sm:$0x1] %v1835_v32 }

</bundles_post_ra>
